<compile_context>
chip_gen: v7x
topology: tpu7x:2x2x1
jax: 0.10.0
libtpu: 0.0.40
codegen_flags: <defaults>
</compile_context>

<pallas_src>
import functools

import jax
import jax.numpy as jnp
import numpy as np
from jax import lax
from jax.experimental import pallas as pl
from jax.experimental.pallas import tpu as pltpu

_T_BLK_MAX = 16    # timesteps per grid iteration
_LANE = 128        # hidden padded to a multiple of this (per-gate slab)
_SUBLANE = 16      # batch padded to a multiple of this (bf16 sublane tile)
_B_TILE_MAX = 128  # batch tile for the parallel grid axis


def _round_up(x, m):
    return ((x + m - 1) // m) * m


def _vmem_limit_bytes(t_blk, b_tile, in_pad, hp, emit_seq):
    """Explicit scoped-VMEM budget for one layer's pallas_call."""
    four_hp = 4 * hp
    total = 0
    total += 2 * t_blk * b_tile * in_pad * 2      # x chunk, bf16, double-buffered
    total += 2 * in_pad * four_hp * 2             # W_ih (bf16)
    total += 2 * four_hp * 4                      # bias (f32)
    total += 2 * hp * four_hp * 2                 # W_hh (bf16)
    if emit_seq:
        total += 2 * t_blk * b_tile * hp * 2      # out chunk, bf16
    else:
        total += 2 * b_tile * 4                   # (b_tile, 1) f32 head output
        total += 2 * (hp * 4 + 4)                 # linear weights / bias
    total += t_blk * b_tile * four_hp * 4         # gx scratch (f32)
    total += 2 * b_tile * hp * 4                  # h, c carries (f32)
    return int(min(max(2 * total + (8 << 20), 32 << 20), 96 << 20))


# ----------------------------------------------------------------------------
# In-kernel recurrent chunk: fused input projection + t_blk LSTM steps,
# h/c carried in VMEM scratch across the sequential grid axis.
# ----------------------------------------------------------------------------
def _run_chunk(x_ref, wih_ref, bias_ref, whh_ref, gx_ref, h_ref, c_ref,
               out_ref, *, hp, t_blk, seq_len, needs_mask):
    chunk = pl.program_id(1)

    @pl.when(chunk == 0)
    def _():
        h_ref[...] = jnp.zeros_like(h_ref)
        c_ref[...] = jnp.zeros_like(c_ref)

    _, b_tile, in_pad = x_ref.shape
    four_hp = 4 * hp

    # Fused, chunk-level input projection: one big bf16 MXU matmul
    # (t_blk*b_tile rows) off the per-step serial path; f32 accumulate + bias.
    xb = x_ref[...].reshape(t_blk * b_tile, in_pad)
    gx = jnp.dot(xb, wih_ref[...], preferred_element_type=jnp.float32)
    gx_ref[...] = (gx + bias_ref[...]).reshape(t_blk, b_tile, four_hp)

    def run_steps(apply_mask):
        def step(lt, carry):
            h_prev = h_ref[...]
            c_prev = c_ref[...]
            # Recurrent matmul: bf16 MXU inputs, f32 accumulation.
            rec = jnp.dot(h_prev.astype(jnp.bfloat16), whh_ref[...],
                          preferred_element_type=jnp.float32)
            gates = gx_ref[lt] + rec                     # (b_tile, 4*Hp) f32
            # Gate slabs laid out [i, f, o | g] (128-aligned): one contiguous
            # sigmoid call and one tanh call, no sub-vreg slicing.
            sig = jax.nn.sigmoid(gates[:, :3 * hp])
            i_g = sig[:, 0 * hp:1 * hp]
            f_g = sig[:, 1 * hp:2 * hp]
            o_g = sig[:, 2 * hp:3 * hp]
            g_g = jnp.tanh(gates[:, 3 * hp:4 * hp])
            c_new = f_g * c_prev + i_g * g_g
            h_new = o_g * jnp.tanh(c_new)
            if apply_mask:
                # Freeze h/c on padded tail timesteps (last chunk only).
                t = chunk * t_blk + lt
                m = (t < seq_len).astype(jnp.float32)
                h_upd = h_prev + m * (h_new - h_prev)
                c_upd = c_prev + m * (c_new - c_prev)
            else:
                h_upd, c_upd = h_new, c_new
            h_ref[...] = h_upd
            c_ref[...] = c_upd
            if out_ref is not None:
                out_ref[lt] = h_upd.astype(out_ref.dtype)
            return carry

        lax.fori_loop(0, t_blk, step, 0, unroll=True)

    if needs_mask:
        is_last = chunk == pl.num_programs(1) - 1

        @pl.when(is_last)
        def _():
            run_steps(True)

        @pl.when(jnp.logical_not(is_last))
        def _():
            run_steps(False)
    else:
        run_steps(False)


def _lstm_seq_kernel(x_ref, wih_ref, bias_ref, whh_ref, out_ref,
                     gx_ref, h_ref, c_ref, *, hp, t_blk, seq_len, needs_mask):
    """Intermediate LSTM layer: emits the full bf16 hidden-state sequence."""
    _run_chunk(x_ref, wih_ref, bias_ref, whh_ref, gx_ref, h_ref, c_ref, out_ref,
               hp=hp, t_blk=t_blk, seq_len=seq_len, needs_mask=needs_mask)


def _lstm_head_kernel(x_ref, wih_ref, bias_ref, whh_ref, wlin_ref, blin_ref,
                      out_ref, gx_ref, h_ref, c_ref, *, hp, t_blk, seq_len,
                      needs_mask):
    """Last LSTM layer fused with Linear(hidden, 1): no per-step writeback."""
    _run_chunk(x_ref, wih_ref, bias_ref, whh_ref, gx_ref, h_ref, c_ref, None,
               hp=hp, t_blk=t_blk, seq_len=seq_len, needs_mask=needs_mask)

    # Linear head as a VPU/XLU reduction on the carried h: only in the last
    # chunk (the output block index is constant over the time axis).
    @pl.when(pl.program_id(1) == pl.num_programs(1) - 1)
    def _():
        out_ref[...] = (jnp.sum(h_ref[...] * wlin_ref[...], axis=1,
                                keepdims=True) + blin_ref[...])


# ----------------------------------------------------------------------------
# pallas_call wrappers
# ----------------------------------------------------------------------------
def _lstm_layer_seq(x_seq, wih, bias, whh, *, hp, t_blk, b_tile, seq_len):
    seq_pad, batch_pad, in_pad = x_seq.shape
    n_chunks = seq_pad // t_blk
    nb = batch_pad // b_tile
    four_hp = 4 * hp
    kernel = functools.partial(_lstm_seq_kernel, hp=hp, t_blk=t_blk,
                               seq_len=seq_len,
                               needs_mask=(seq_pad != seq_len))
    return pl.pallas_call(
        kernel,
        out_shape=jax.ShapeDtypeStruct((seq_pad, batch_pad, hp), jnp.bfloat16),
        grid_spec=pltpu.PrefetchScalarGridSpec(
            num_scalar_prefetch=0,
            grid=(nb, n_chunks),
            in_specs=[
                pl.BlockSpec((t_blk, b_tile, in_pad), lambda b, c: (c, b, 0)),
                pl.BlockSpec((in_pad, four_hp), lambda b, c: (0, 0)),
                pl.BlockSpec((1, four_hp), lambda b, c: (0, 0)),
                pl.BlockSpec((hp, four_hp), lambda b, c: (0, 0)),
            ],
            out_specs=pl.BlockSpec((t_blk, b_tile, hp), lambda b, c: (c, b, 0)),
            scratch_shapes=[
                pltpu.VMEM((t_blk, b_tile, four_hp), jnp.float32),  # gx chunk
                pltpu.VMEM((b_tile, hp), jnp.float32),              # h carry
                pltpu.VMEM((b_tile, hp), jnp.float32),              # c carry
            ]),
        compiler_params=pltpu.CompilerParams(
            dimension_semantics=("parallel", "arbitrary"),
            vmem_limit_bytes=_vmem_limit_bytes(t_blk, b_tile, in_pad, hp,
                                               emit_seq=True)),
    )(x_seq, wih, bias, whh)


def _lstm_layer_head(x_seq, wih, bias, whh, lin_w_row, lin_b, *, hp, t_blk,
                     b_tile, seq_len):
    seq_pad, batch_pad, in_pad = x_seq.shape
    n_chunks = seq_pad // t_blk
    nb = batch_pad // b_tile
    four_hp = 4 * hp
    kernel = functools.partial(_lstm_head_kernel, hp=hp, t_blk=t_blk,
                               seq_len=seq_len,
                               needs_mask=(seq_pad != seq_len))
    return pl.pallas_call(
        kernel,
        out_shape=jax.ShapeDtypeStruct((batch_pad, 1), jnp.float32),
        grid_spec=pltpu.PrefetchScalarGridSpec(
            num_scalar_prefetch=0,
            grid=(nb, n_chunks),
            in_specs=[
                pl.BlockSpec((t_blk, b_tile, in_pad), lambda b, c: (c, b, 0)),
                pl.BlockSpec((in_pad, four_hp), lambda b, c: (0, 0)),
                pl.BlockSpec((1, four_hp), lambda b, c: (0, 0)),
                pl.BlockSpec((hp, four_hp), lambda b, c: (0, 0)),
                pl.BlockSpec((1, hp), lambda b, c: (0, 0)),
                pl.BlockSpec((1, 1), lambda b, c: (0, 0)),
            ],
            out_specs=pl.BlockSpec((b_tile, 1), lambda b, c: (b, 0)),
            scratch_shapes=[
                pltpu.VMEM((t_blk, b_tile, four_hp), jnp.float32),  # gx chunk
                pltpu.VMEM((b_tile, hp), jnp.float32),              # h carry
                pltpu.VMEM((b_tile, hp), jnp.float32),              # c carry
            ]),
        compiler_params=pltpu.CompilerParams(
            dimension_semantics=("parallel", "arbitrary"),
            vmem_limit_bytes=_vmem_limit_bytes(t_blk, b_tile, in_pad, hp,
                                               emit_seq=False)),
    )(x_seq, wih, bias, whh, lin_w_row, lin_b)


# ----------------------------------------------------------------------------
# Params: PyTorch-style init + one-time device-layout prep
# ----------------------------------------------------------------------------
def init_lstm_model_params(key, input_size, hidden_size, num_layers):
    bound = 1.0 / np.sqrt(hidden_size)
    params = {"layers": []}
    for layer in range(num_layers):
        in_feat = input_size if layer == 0 else hidden_size
        key, k1, k2, k3, k4 = jax.random.split(key, 5)
        w_ih = jax.random.uniform(k1, (4 * hidden_size, in_feat),
                                  jnp.float32, -bound, bound)
        w_hh = jax.random.uniform(k2, (4 * hidden_size, hidden_size),
                                  jnp.float32, -bound, bound)
        b_ih = jax.random.uniform(k3, (4 * hidden_size,), jnp.float32,
                                  -bound, bound)
        b_hh = jax.random.uniform(k4, (4 * hidden_size,), jnp.float32,
                                  -bound, bound)
        params["layers"].append(dict(w_ih=w_ih, w_hh=w_hh,
                                     b_ih=b_ih, b_hh=b_hh))
    key, k5, k6 = jax.random.split(key, 3)
    params["lin_w"] = jax.random.uniform(k5, (1, hidden_size), jnp.float32,
                                         -bound, bound)
    params["lin_b"] = jax.random.uniform(k6, (1,), jnp.float32, -bound, bound)
    return params


_GATE_ORDER = (0, 1, 3, 2)   # PyTorch [i, f, g, o] -> kernel layout [i, f, o, g]


def prepare_lstm_params(params, input_size, hidden_size):
    """One-time weight prep: transpose, combine biases, pad hidden to a
    multiple of 128 with per-gate 128-aligned slabs, reorder gates to
    [i, f, o, g], cast MXU operands to bf16."""
    H = hidden_size
    H_pad = _round_up(H, _LANE)
    layers = []
    for li, lp in enumerate(params["layers"]):
        in_dim = input_size if li == 0 else H
        in_pad = input_size if li == 0 else H_pad
        w_ih_t = jnp.transpose(lp["w_ih"])          # (in_dim, 4H)
        w_hh_t = jnp.transpose(lp["w_hh"])          # (H, 4H)
        bias = lp["b_ih"] + lp["b_hh"]              # (4H,)
        w_ih_p = jnp.zeros((in_pad, 4 * H_pad), jnp.bfloat16)
        w_hh_p = jnp.zeros((H_pad, 4 * H_pad), jnp.bfloat16)
        b_p = jnp.zeros((1, 4 * H_pad), jnp.float32)
        for k, g in enumerate(_GATE_ORDER):
            col = slice(k * H_pad, k * H_pad + H)
            src = slice(g * H, (g + 1) * H)
            w_ih_p = w_ih_p.at[:in_dim, col].set(
                w_ih_t[:, src].astype(jnp.bfloat16))
            w_hh_p = w_hh_p.at[:H, col].set(
                w_hh_t[:, src].astype(jnp.bfloat16))
            b_p = b_p.at[0, col].set(bias[src])
        layers.append(dict(w_ih_t=w_ih_p, w_hh_t=w_hh_p, bias=b_p))
    lin_w_row = jnp.zeros((1, H_pad), jnp.float32).at[:, :H].set(params["lin_w"])
    lin_b = params["lin_b"].reshape(1, 1).astype(jnp.float32)
    return {"layers": layers, "lin_w_row": lin_w_row, "lin_b": lin_b}


# ----------------------------------------------------------------------------
# Forward pass (eval mode)
# ----------------------------------------------------------------------------
def lstm_model_forward(prepped, x):
    """x: (batch, seq, input_size) -> (batch, 1)."""
    # TODO(synk): inter-layer dropout (p=0.2) is a no-op in eval mode; training
    # mode dropout is not implemented.
    x = x.astype(jnp.float32)
    batch, seq, _ = x.shape
    hp = prepped["layers"][0]["w_hh_t"].shape[0]
    t_blk = min(seq, _T_BLK_MAX)
    seq_pad = _round_up(seq, t_blk)
    batch_pad = _round_up(batch, _SUBLANE)
    # Batch tile for the "parallel" grid axis (v7x megacore sharding).
    if batch_pad <= _B_TILE_MAX:
        b_tile = batch_pad
    else:
        batch_pad = _round_up(batch, _B_TILE_MAX)
        b_tile = _B_TILE_MAX

    x_tm = jnp.transpose(x, (1, 0, 2))                          # (seq, batch, in)
    x_tm = jnp.pad(x_tm, ((0, seq_pad - seq), (0, batch_pad - batch), (0, 0)))
    h_seq = x_tm.astype(jnp.bfloat16)

    n_layers = len(prepped["layers"])
    out = None
    for li, lp in enumerate(prepped["layers"]):
        if li < n_layers - 1:
            h_seq = _lstm_layer_seq(h_seq, lp["w_ih_t"], lp["bias"],
                                    lp["w_hh_t"], hp=hp, t_blk=t_blk,
                                    b_tile=b_tile, seq_len=seq)
        else:
            out = _lstm_layer_head(h_seq, lp["w_ih_t"], lp["bias"],
                                   lp["w_hh_t"], prepped["lin_w_row"],
                                   prepped["lin_b"], hp=hp, t_blk=t_blk,
                                   b_tile=b_tile, seq_len=seq)
    return out[:batch]


# ----------------------------------------------------------------------------
# Pure-JAX f32 reference (lax.scan) matching PyTorch semantics
# ----------------------------------------------------------------------------
def lstm_model_reference(params, x):
    x_tm = jnp.transpose(x, (1, 0, 2)).astype(jnp.float32)
    for lp in params["layers"]:
        H = lp["w_hh"].shape[1]
        w_ih_t = jnp.transpose(lp["w_ih"])
        w_hh_t = jnp.transpose(lp["w_hh"])
        bias = lp["b_ih"] + lp["b_hh"]

        def step(carry, x_t, w_ih_t=w_ih_t, w_hh_t=w_hh_t, bias=bias, H=H):
            h, c = carry
            g = x_t @ w_ih_t + h @ w_hh_t + bias
            i = jax.nn.sigmoid(g[:, 0 * H:1 * H])
            f = jax.nn.sigmoid(g[:, 1 * H:2 * H])
            gg = jnp.tanh(g[:, 2 * H:3 * H])
            o = jax.nn.sigmoid(g[:, 3 * H:4 * H])
            c = f * c + i * gg
            h = o * jnp.tanh(c)
            return (h, c), h

        batch = x_tm.shape[1]
        init = (jnp.zeros((batch, H), jnp.float32),
                jnp.zeros((batch, H), jnp.float32))
        _, x_tm = lax.scan(step, init, x_tm)
    h_last = x_tm[-1]
    return h_last @ jnp.transpose(params["lin_w"]) + params["lin_b"]


if __name__ == "__main__":
    batch, seq, input_size, hidden_size, num_layers = 2, 8, 16, 32, 2

    key = jax.random.PRNGKey(0)
    key, pkey, xkey = jax.random.split(key, 3)
    params = init_lstm_model_params(pkey, input_size, hidden_size, num_layers)
    prepped = prepare_lstm_params(params, input_size, hidden_size)
    x = jax.random.normal(xkey, (batch, seq, input_size), jnp.float32)

    out = jax.block_until_ready(lstm_model_forward(prepped, x))
    ref = jax.block_until_ready(lstm_model_reference(params, x))

    assert out.shape == (batch, 1), out.shape
    # bf16 MXU operands -> looser tolerance than the pure-f32 reference.
    np.testing.assert_allclose(np.asarray(out), np.asarray(ref),
                               rtol=3e-2, atol=3e-2)
    print("KERNEL_OK")
</pallas_src>

<mosaic_0001>
module attributes {stable_mosaic.version = 11 : i64} {
  func.func @_lstm_seq_kernel(%arg0: i32, %arg1: i32, %arg2: memref<8x16x16xbf16, #tpu.memory_space<vmem>>, %arg3: memref<16x512xbf16, #tpu.memory_space<vmem>>, %arg4: memref<1x512xf32, #tpu.memory_space<vmem>>, %arg5: memref<128x512xbf16, #tpu.memory_space<vmem>>, %arg6: memref<8x16x128xbf16, #tpu.memory_space<vmem>>, %arg7: memref<8x16x512xf32, #tpu.memory_space<vmem>>, %arg8: memref<16x128xf32, #tpu.memory_space<vmem>>, %arg9: memref<16x128xf32, #tpu.memory_space<vmem>>) attributes {dimension_semantics = [#tpu.dimension_semantics<parallel>, #tpu.dimension_semantics<arbitrary>], iteration_bounds = array<i64: 1, 1>, scalar_prefetch = 0 : i64, scratch_operands = 3 : i64, tpu.core_type = #tpu.core_type<tc>, window_params = [{transform_indices = @transform_0, window_bounds = array<i64: 8, 16, 16>}, {pipeline_mode = #tpu.pipeline_mode<synchronous>, transform_indices = @transform_1, window_bounds = array<i64: 16, 512>}, {pipeline_mode = #tpu.pipeline_mode<synchronous>, transform_indices = @transform_2, window_bounds = array<i64: 1, 512>}, {pipeline_mode = #tpu.pipeline_mode<synchronous>, transform_indices = @transform_3, window_bounds = array<i64: 128, 512>}, {transform_indices = @transform_4, window_bounds = array<i64: 8, 16, 128>}]} {
    %c0_i32 = arith.constant 0 : i32
    %0 = arith.cmpi eq, %arg1, %c0_i32 : i32
    %1 = arith.extui %0 : i1 to i32
    %c0_i32_0 = arith.constant 0 : i32
    %2 = arith.cmpi ne, %1, %c0_i32_0 : i32
    scf.if %2 {
      %cst_139 = arith.constant 0.000000e+00 : f32
      %268 = vector.broadcast %cst_139 : f32 to vector<16x128xf32>
      %c0_140 = arith.constant 0 : index
      %c0_141 = arith.constant 0 : index
      %269 = vector.load %arg8[%c0_140, %c0_141] : memref<16x128xf32, #tpu.memory_space<vmem>>, vector<16x128xf32>
      tpu.vector_store %arg8[%c0_140, %c0_141], %268 {strides = array<i32>} : memref<16x128xf32, #tpu.memory_space<vmem>>, vector<16x128xf32>,
      %cst_142 = arith.constant 0.000000e+00 : f32
      %270 = vector.broadcast %cst_142 : f32 to vector<16x128xf32>
      %c0_143 = arith.constant 0 : index
      %c0_144 = arith.constant 0 : index
      %271 = vector.load %arg9[%c0_143, %c0_144] : memref<16x128xf32, #tpu.memory_space<vmem>>, vector<16x128xf32>
      tpu.vector_store %arg9[%c0_143, %c0_144], %270 {strides = array<i32>} : memref<16x128xf32, #tpu.memory_space<vmem>>, vector<16x128xf32>,
    } else {
    }
    %c0 = arith.constant 0 : index
    %c0_1 = arith.constant 0 : index
    %c0_2 = arith.constant 0 : index
    %3 = vector.load %arg2[%c0, %c0_1, %c0_2] : memref<8x16x16xbf16, #tpu.memory_space<vmem>>, vector<8x16x16xbf16>
    %4 = vector.shape_cast %3 : vector<8x16x16xbf16> to vector<128x16xbf16>
    %c0_3 = arith.constant 0 : index
    %c0_4 = arith.constant 0 : index
    %5 = vector.load %arg3[%c0_3, %c0_4] : memref<16x512xbf16, #tpu.memory_space<vmem>>, vector<16x512xbf16>
    %cst = arith.constant dense<0.000000e+00> : vector<128x512xf32>
    %6 = tpu.matmul %4, %5, %cst {dimension_numbers = #tpu.dot_dimension_numbers<[1], [0], [0], [1], [0, 0, 1, 1], [], []>} : vector<128x16xbf16>, vector<16x512xbf16>, vector<128x512xf32> -> vector<128x512xf32>
    %c0_5 = arith.constant 0 : index
    %c0_6 = arith.constant 0 : index
    %7 = vector.load %arg4[%c0_5, %c0_6] : memref<1x512xf32, #tpu.memory_space<vmem>>, vector<1x512xf32>
    %8 = vector.broadcast %7 : vector<1x512xf32> to vector<128x512xf32>
    %9 = arith.addf %6, %8 : vector<128x512xf32>
    %10 = vector.shape_cast %9 : vector<128x512xf32> to vector<8x16x512xf32>
    %c0_7 = arith.constant 0 : index
    %c0_8 = arith.constant 0 : index
    %c0_9 = arith.constant 0 : index
    %11 = vector.load %arg7[%c0_7, %c0_8, %c0_9] : memref<8x16x512xf32, #tpu.memory_space<vmem>>, vector<8x16x512xf32>
    tpu.vector_store %arg7[%c0_7, %c0_8, %c0_9], %10 {strides = array<i32>} : memref<8x16x512xf32, #tpu.memory_space<vmem>>, vector<8x16x512xf32>,
    %c0_i32_10 = arith.constant 0 : i32
    %c0_11 = arith.constant 0 : index
    %c0_12 = arith.constant 0 : index
    %12 = vector.load %arg8[%c0_11, %c0_12] : memref<16x128xf32, #tpu.memory_space<vmem>>, vector<16x128xf32>
    %c0_13 = arith.constant 0 : index
    %c0_14 = arith.constant 0 : index
    %13 = vector.load %arg9[%c0_13, %c0_14] : memref<16x128xf32, #tpu.memory_space<vmem>>, vector<16x128xf32>
    %14 = arith.truncf %12 : vector<16x128xf32> to vector<16x128xbf16>
    %c0_15 = arith.constant 0 : index
    %c0_16 = arith.constant 0 : index
    %15 = vector.load %arg5[%c0_15, %c0_16] : memref<128x512xbf16, #tpu.memory_space<vmem>>, vector<128x512xbf16>
    %cst_17 = arith.constant dense<0.000000e+00> : vector<16x512xf32>
    %16 = tpu.matmul %14, %15, %cst_17 {dimension_numbers = #tpu.dot_dimension_numbers<[1], [0], [0], [1], [0, 0, 1, 1], [], []>} : vector<16x128xbf16>, vector<128x512xbf16>, vector<16x512xf32> -> vector<16x512xf32>
    %17 = arith.index_cast %c0_i32_10 : i32 to index
    %c0_18 = arith.constant 0 : index
    %c0_19 = arith.constant 0 : index
    %18 = vector.load %arg7[%17, %c0_18, %c0_19] : memref<8x16x512xf32, #tpu.memory_space<vmem>>, vector<1x16x512xf32>
    %19 = vector.shape_cast %18 : vector<1x16x512xf32> to vector<16x512xf32>
    %20 = arith.addf %19, %16 : vector<16x512xf32>
    %21 = vector.extract_strided_slice %20 {offsets = [0, 0], sizes = [16, 384], strides = [1, 1]} : vector<16x512xf32> to vector<16x384xf32>
    %22 = arith.negf %21 : vector<16x384xf32>
    %23 = math.exp %22 : vector<16x384xf32>
    %cst_20 = arith.constant 1.000000e+00 : f32
    %24 = vector.broadcast %cst_20 : f32 to vector<16x384xf32>
    %25 = arith.addf %24, %23 : vector<16x384xf32>
    %26 = arith.divf %24, %25 : vector<16x384xf32>
    %27 = vector.extract_strided_slice %26 {offsets = [0, 0], sizes = [16, 128], strides = [1, 1]} : vector<16x384xf32> to vector<16x128xf32>
    %28 = vector.extract_strided_slice %26 {offsets = [0, 128], sizes = [16, 128], strides = [1, 1]} : vector<16x384xf32> to vector<16x128xf32>
    %29 = vector.extract_strided_slice %26 {offsets = [0, 256], sizes = [16, 128], strides = [1, 1]} : vector<16x384xf32> to vector<16x128xf32>
    %30 = vector.extract_strided_slice %20 {offsets = [0, 384], sizes = [16, 128], strides = [1, 1]} : vector<16x512xf32> to vector<16x128xf32>
    %31 = math.tanh %30 : vector<16x128xf32>
    %32 = arith.mulf %28, %13 : vector<16x128xf32>
    %33 = arith.mulf %27, %31 : vector<16x128xf32>
    %34 = arith.addf %32, %33 : vector<16x128xf32>
    %35 = math.tanh %34 : vector<16x128xf32>
    %36 = arith.mulf %29, %35 : vector<16x128xf32>
    %c0_21 = arith.constant 0 : index
    %c0_22 = arith.constant 0 : index
    %37 = vector.load %arg8[%c0_21, %c0_22] : memref<16x128xf32, #tpu.memory_space<vmem>>, vector<16x128xf32>
    tpu.vector_store %arg8[%c0_21, %c0_22], %36 {strides = array<i32>} : memref<16x128xf32, #tpu.memory_space<vmem>>, vector<16x128xf32>,
    %c0_23 = arith.constant 0 : index
    %c0_24 = arith.constant 0 : index
    %38 = vector.load %arg9[%c0_23, %c0_24] : memref<16x128xf32, #tpu.memory_space<vmem>>, vector<16x128xf32>
    tpu.vector_store %arg9[%c0_23, %c0_24], %34 {strides = array<i32>} : memref<16x128xf32, #tpu.memory_space<vmem>>, vector<16x128xf32>,
    %39 = arith.truncf %36 : vector<16x128xf32> to vector<16x128xbf16>
    %40 = arith.index_cast %c0_i32_10 : i32 to index
    %c0_25 = arith.constant 0 : index
    %c0_26 = arith.constant 0 : index
    %41 = vector.load %arg6[%40, %c0_25, %c0_26] : memref<8x16x128xbf16, #tpu.memory_space<vmem>>, vector<1x16x128xbf16>
    %42 = vector.shape_cast %41 : vector<1x16x128xbf16> to vector<16x128xbf16>
    %43 = vector.shape_cast %39 : vector<16x128xbf16> to vector<1x16x128xbf16>
    tpu.vector_store %arg6[%40, %c0_25, %c0_26], %43 {strides = array<i32>} : memref<8x16x128xbf16, #tpu.memory_space<vmem>>, vector<1x16x128xbf16>,
    %c1_i32 = arith.constant 1 : i32
    %c0_27 = arith.constant 0 : index
    %c0_28 = arith.constant 0 : index
    %44 = vector.load %arg8[%c0_27, %c0_28] : memref<16x128xf32, #tpu.memory_space<vmem>>, vector<16x128xf32>
    %c0_29 = arith.constant 0 : index
    %c0_30 = arith.constant 0 : index
    %45 = vector.load %arg9[%c0_29, %c0_30] : memref<16x128xf32, #tpu.memory_space<vmem>>, vector<16x128xf32>
    %46 = arith.truncf %44 : vector<16x128xf32> to vector<16x128xbf16>
    %c0_31 = arith.constant 0 : index
    %c0_32 = arith.constant 0 : index
    %47 = vector.load %arg5[%c0_31, %c0_32] : memref<128x512xbf16, #tpu.memory_space<vmem>>, vector<128x512xbf16>
    %cst_33 = arith.constant dense<0.000000e+00> : vector<16x512xf32>
    %48 = tpu.matmul %46, %47, %cst_33 {dimension_numbers = #tpu.dot_dimension_numbers<[1], [0], [0], [1], [0, 0, 1, 1], [], []>} : vector<16x128xbf16>, vector<128x512xbf16>, vector<16x512xf32> -> vector<16x512xf32>
    %49 = arith.index_cast %c1_i32 : i32 to index
    %c0_34 = arith.constant 0 : index
    %c0_35 = arith.constant 0 : index
    %50 = vector.load %arg7[%49, %c0_34, %c0_35] : memref<8x16x512xf32, #tpu.memory_space<vmem>>, vector<1x16x512xf32>
    %51 = vector.shape_cast %50 : vector<1x16x512xf32> to vector<16x512xf32>
    %52 = arith.addf %51, %48 : vector<16x512xf32>
    %53 = vector.extract_strided_slice %52 {offsets = [0, 0], sizes = [16, 384], strides = [1, 1]} : vector<16x512xf32> to vector<16x384xf32>
    %54 = arith.negf %53 : vector<16x384xf32>
    %55 = math.exp %54 : vector<16x384xf32>
    %cst_36 = arith.constant 1.000000e+00 : f32
    %56 = vector.broadcast %cst_36 : f32 to vector<16x384xf32>
    %57 = arith.addf %56, %55 : vector<16x384xf32>
    %58 = arith.divf %56, %57 : vector<16x384xf32>
    %59 = vector.extract_strided_slice %58 {offsets = [0, 0], sizes = [16, 128], strides = [1, 1]} : vector<16x384xf32> to vector<16x128xf32>
    %60 = vector.extract_strided_slice %58 {offsets = [0, 128], sizes = [16, 128], strides = [1, 1]} : vector<16x384xf32> to vector<16x128xf32>
    %61 = vector.extract_strided_slice %58 {offsets = [0, 256], sizes = [16, 128], strides = [1, 1]} : vector<16x384xf32> to vector<16x128xf32>
    %62 = vector.extract_strided_slice %52 {offsets = [0, 384], sizes = [16, 128], strides = [1, 1]} : vector<16x512xf32> to vector<16x128xf32>
    %63 = math.tanh %62 : vector<16x128xf32>
    %64 = arith.mulf %60, %45 : vector<16x128xf32>
    %65 = arith.mulf %59, %63 : vector<16x128xf32>
    %66 = arith.addf %64, %65 : vector<16x128xf32>
    %67 = math.tanh %66 : vector<16x128xf32>
    %68 = arith.mulf %61, %67 : vector<16x128xf32>
    %c0_37 = arith.constant 0 : index
    %c0_38 = arith.constant 0 : index
    %69 = vector.load %arg8[%c0_37, %c0_38] : memref<16x128xf32, #tpu.memory_space<vmem>>, vector<16x128xf32>
    tpu.vector_store %arg8[%c0_37, %c0_38], %68 {strides = array<i32>} : memref<16x128xf32, #tpu.memory_space<vmem>>, vector<16x128xf32>,
    %c0_39 = arith.constant 0 : index
    %c0_40 = arith.constant 0 : index
    %70 = vector.load %arg9[%c0_39, %c0_40] : memref<16x128xf32, #tpu.memory_space<vmem>>, vector<16x128xf32>
    tpu.vector_store %arg9[%c0_39, %c0_40], %66 {strides = array<i32>} : memref<16x128xf32, #tpu.memory_space<vmem>>, vector<16x128xf32>,
    %71 = arith.truncf %68 : vector<16x128xf32> to vector<16x128xbf16>
    %72 = arith.index_cast %c1_i32 : i32 to index
    %c0_41 = arith.constant 0 : index
    %c0_42 = arith.constant 0 : index
    %73 = vector.load %arg6[%72, %c0_41, %c0_42] : memref<8x16x128xbf16, #tpu.memory_space<vmem>>, vector<1x16x128xbf16>
    %74 = vector.shape_cast %73 : vector<1x16x128xbf16> to vector<16x128xbf16>
    %75 = vector.shape_cast %71 : vector<16x128xbf16> to vector<1x16x128xbf16>
    tpu.vector_store %arg6[%72, %c0_41, %c0_42], %75 {strides = array<i32>} : memref<8x16x128xbf16, #tpu.memory_space<vmem>>, vector<1x16x128xbf16>,
    %c2_i32 = arith.constant 2 : i32
    %c0_43 = arith.constant 0 : index
    %c0_44 = arith.constant 0 : index
    %76 = vector.load %arg8[%c0_43, %c0_44] : memref<16x128xf32, #tpu.memory_space<vmem>>, vector<16x128xf32>
    %c0_45 = arith.constant 0 : index
    %c0_46 = arith.constant 0 : index
    %77 = vector.load %arg9[%c0_45, %c0_46] : memref<16x128xf32, #tpu.memory_space<vmem>>, vector<16x128xf32>
    %78 = arith.truncf %76 : vector<16x128xf32> to vector<16x128xbf16>
    %c0_47 = arith.constant 0 : index
    %c0_48 = arith.constant 0 : index
    %79 = vector.load %arg5[%c0_47, %c0_48] : memref<128x512xbf16, #tpu.memory_space<vmem>>, vector<128x512xbf16>
    %cst_49 = arith.constant dense<0.000000e+00> : vector<16x512xf32>
    %80 = tpu.matmul %78, %79, %cst_49 {dimension_numbers = #tpu.dot_dimension_numbers<[1], [0], [0], [1], [0, 0, 1, 1], [], []>} : vector<16x128xbf16>, vector<128x512xbf16>, vector<16x512xf32> -> vector<16x512xf32>
    %81 = arith.index_cast %c2_i32 : i32 to index
    %c0_50 = arith.constant 0 : index
    %c0_51 = arith.constant 0 : index
    %82 = vector.load %arg7[%81, %c0_50, %c0_51] : memref<8x16x512xf32, #tpu.memory_space<vmem>>, vector<1x16x512xf32>
    %83 = vector.shape_cast %82 : vector<1x16x512xf32> to vector<16x512xf32>
    %84 = arith.addf %83, %80 : vector<16x512xf32>
    %85 = vector.extract_strided_slice %84 {offsets = [0, 0], sizes = [16, 384], strides = [1, 1]} : vector<16x512xf32> to vector<16x384xf32>
    %86 = arith.negf %85 : vector<16x384xf32>
    %87 = math.exp %86 : vector<16x384xf32>
    %cst_52 = arith.constant 1.000000e+00 : f32
    %88 = vector.broadcast %cst_52 : f32 to vector<16x384xf32>
    %89 = arith.addf %88, %87 : vector<16x384xf32>
    %90 = arith.divf %88, %89 : vector<16x384xf32>
    %91 = vector.extract_strided_slice %90 {offsets = [0, 0], sizes = [16, 128], strides = [1, 1]} : vector<16x384xf32> to vector<16x128xf32>
    %92 = vector.extract_strided_slice %90 {offsets = [0, 128], sizes = [16, 128], strides = [1, 1]} : vector<16x384xf32> to vector<16x128xf32>
    %93 = vector.extract_strided_slice %90 {offsets = [0, 256], sizes = [16, 128], strides = [1, 1]} : vector<16x384xf32> to vector<16x128xf32>
    %94 = vector.extract_strided_slice %84 {offsets = [0, 384], sizes = [16, 128], strides = [1, 1]} : vector<16x512xf32> to vector<16x128xf32>
    %95 = math.tanh %94 : vector<16x128xf32>
    %96 = arith.mulf %92, %77 : vector<16x128xf32>
    %97 = arith.mulf %91, %95 : vector<16x128xf32>
    %98 = arith.addf %96, %97 : vector<16x128xf32>
    %99 = math.tanh %98 : vector<16x128xf32>
    %100 = arith.mulf %93, %99 : vector<16x128xf32>
    %c0_53 = arith.constant 0 : index
    %c0_54 = arith.constant 0 : index
    %101 = vector.load %arg8[%c0_53, %c0_54] : memref<16x128xf32, #tpu.memory_space<vmem>>, vector<16x128xf32>
    tpu.vector_store %arg8[%c0_53, %c0_54], %100 {strides = array<i32>} : memref<16x128xf32, #tpu.memory_space<vmem>>, vector<16x128xf32>,
    %c0_55 = arith.constant 0 : index
    %c0_56 = arith.constant 0 : index
    %102 = vector.load %arg9[%c0_55, %c0_56] : memref<16x128xf32, #tpu.memory_space<vmem>>, vector<16x128xf32>
    tpu.vector_store %arg9[%c0_55, %c0_56], %98 {strides = array<i32>} : memref<16x128xf32, #tpu.memory_space<vmem>>, vector<16x128xf32>,
    %103 = arith.truncf %100 : vector<16x128xf32> to vector<16x128xbf16>
    %104 = arith.index_cast %c2_i32 : i32 to index
    %c0_57 = arith.constant 0 : index
    %c0_58 = arith.constant 0 : index
    %105 = vector.load %arg6[%104, %c0_57, %c0_58] : memref<8x16x128xbf16, #tpu.memory_space<vmem>>, vector<1x16x128xbf16>
    %106 = vector.shape_cast %105 : vector<1x16x128xbf16> to vector<16x128xbf16>
    %107 = vector.shape_cast %103 : vector<16x128xbf16> to vector<1x16x128xbf16>
    tpu.vector_store %arg6[%104, %c0_57, %c0_58], %107 {strides = array<i32>} : memref<8x16x128xbf16, #tpu.memory_space<vmem>>, vector<1x16x128xbf16>,
    %c3_i32 = arith.constant 3 : i32
    %c0_59 = arith.constant 0 : index
    %c0_60 = arith.constant 0 : index
    %108 = vector.load %arg8[%c0_59, %c0_60] : memref<16x128xf32, #tpu.memory_space<vmem>>, vector<16x128xf32>
    %c0_61 = arith.constant 0 : index
    %c0_62 = arith.constant 0 : index
    %109 = vector.load %arg9[%c0_61, %c0_62] : memref<16x128xf32, #tpu.memory_space<vmem>>, vector<16x128xf32>
    %110 = arith.truncf %108 : vector<16x128xf32> to vector<16x128xbf16>
    %c0_63 = arith.constant 0 : index
    %c0_64 = arith.constant 0 : index
    %111 = vector.load %arg5[%c0_63, %c0_64] : memref<128x512xbf16, #tpu.memory_space<vmem>>, vector<128x512xbf16>
    %cst_65 = arith.constant dense<0.000000e+00> : vector<16x512xf32>
    %112 = tpu.matmul %110, %111, %cst_65 {dimension_numbers = #tpu.dot_dimension_numbers<[1], [0], [0], [1], [0, 0, 1, 1], [], []>} : vector<16x128xbf16>, vector<128x512xbf16>, vector<16x512xf32> -> vector<16x512xf32>
    %113 = arith.index_cast %c3_i32 : i32 to index
    %c0_66 = arith.constant 0 : index
    %c0_67 = arith.constant 0 : index
    %114 = vector.load %arg7[%113, %c0_66, %c0_67] : memref<8x16x512xf32, #tpu.memory_space<vmem>>, vector<1x16x512xf32>
    %115 = vector.shape_cast %114 : vector<1x16x512xf32> to vector<16x512xf32>
    %116 = arith.addf %115, %112 : vector<16x512xf32>
    %117 = vector.extract_strided_slice %116 {offsets = [0, 0], sizes = [16, 384], strides = [1, 1]} : vector<16x512xf32> to vector<16x384xf32>
    %118 = arith.negf %117 : vector<16x384xf32>
    %119 = math.exp %118 : vector<16x384xf32>
    %cst_68 = arith.constant 1.000000e+00 : f32
    %120 = vector.broadcast %cst_68 : f32 to vector<16x384xf32>
    %121 = arith.addf %120, %119 : vector<16x384xf32>
    %122 = arith.divf %120, %121 : vector<16x384xf32>
    %123 = vector.extract_strided_slice %122 {offsets = [0, 0], sizes = [16, 128], strides = [1, 1]} : vector<16x384xf32> to vector<16x128xf32>
    %124 = vector.extract_strided_slice %122 {offsets = [0, 128], sizes = [16, 128], strides = [1, 1]} : vector<16x384xf32> to vector<16x128xf32>
    %125 = vector.extract_strided_slice %122 {offsets = [0, 256], sizes = [16, 128], strides = [1, 1]} : vector<16x384xf32> to vector<16x128xf32>
    %126 = vector.extract_strided_slice %116 {offsets = [0, 384], sizes = [16, 128], strides = [1, 1]} : vector<16x512xf32> to vector<16x128xf32>
    %127 = math.tanh %126 : vector<16x128xf32>
    %128 = arith.mulf %124, %109 : vector<16x128xf32>
    %129 = arith.mulf %123, %127 : vector<16x128xf32>
    %130 = arith.addf %128, %129 : vector<16x128xf32>
    %131 = math.tanh %130 : vector<16x128xf32>
    %132 = arith.mulf %125, %131 : vector<16x128xf32>
    %c0_69 = arith.constant 0 : index
    %c0_70 = arith.constant 0 : index
    %133 = vector.load %arg8[%c0_69, %c0_70] : memref<16x128xf32, #tpu.memory_space<vmem>>, vector<16x128xf32>
    tpu.vector_store %arg8[%c0_69, %c0_70], %132 {strides = array<i32>} : memref<16x128xf32, #tpu.memory_space<vmem>>, vector<16x128xf32>,
    %c0_71 = arith.constant 0 : index
    %c0_72 = arith.constant 0 : index
    %134 = vector.load %arg9[%c0_71, %c0_72] : memref<16x128xf32, #tpu.memory_space<vmem>>, vector<16x128xf32>
    tpu.vector_store %arg9[%c0_71, %c0_72], %130 {strides = array<i32>} : memref<16x128xf32, #tpu.memory_space<vmem>>, vector<16x128xf32>,
    %135 = arith.truncf %132 : vector<16x128xf32> to vector<16x128xbf16>
    %136 = arith.index_cast %c3_i32 : i32 to index
    %c0_73 = arith.constant 0 : index
    %c0_74 = arith.constant 0 : index
    %137 = vector.load %arg6[%136, %c0_73, %c0_74] : memref<8x16x128xbf16, #tpu.memory_space<vmem>>, vector<1x16x128xbf16>
    %138 = vector.shape_cast %137 : vector<1x16x128xbf16> to vector<16x128xbf16>
    %139 = vector.shape_cast %135 : vector<16x128xbf16> to vector<1x16x128xbf16>
    tpu.vector_store %arg6[%136, %c0_73, %c0_74], %139 {strides = array<i32>} : memref<8x16x128xbf16, #tpu.memory_space<vmem>>, vector<1x16x128xbf16>,
    %c4_i32 = arith.constant 4 : i32
    %c0_75 = arith.constant 0 : index
    %c0_76 = arith.constant 0 : index
    %140 = vector.load %arg8[%c0_75, %c0_76] : memref<16x128xf32, #tpu.memory_space<vmem>>, vector<16x128xf32>
    %c0_77 = arith.constant 0 : index
    %c0_78 = arith.constant 0 : index
    %141 = vector.load %arg9[%c0_77, %c0_78] : memref<16x128xf32, #tpu.memory_space<vmem>>, vector<16x128xf32>
    %142 = arith.truncf %140 : vector<16x128xf32> to vector<16x128xbf16>
    %c0_79 = arith.constant 0 : index
    %c0_80 = arith.constant 0 : index
    %143 = vector.load %arg5[%c0_79, %c0_80] : memref<128x512xbf16, #tpu.memory_space<vmem>>, vector<128x512xbf16>
    %cst_81 = arith.constant dense<0.000000e+00> : vector<16x512xf32>
    %144 = tpu.matmul %142, %143, %cst_81 {dimension_numbers = #tpu.dot_dimension_numbers<[1], [0], [0], [1], [0, 0, 1, 1], [], []>} : vector<16x128xbf16>, vector<128x512xbf16>, vector<16x512xf32> -> vector<16x512xf32>
    %145 = arith.index_cast %c4_i32 : i32 to index
    %c0_82 = arith.constant 0 : index
    %c0_83 = arith.constant 0 : index
    %146 = vector.load %arg7[%145, %c0_82, %c0_83] : memref<8x16x512xf32, #tpu.memory_space<vmem>>, vector<1x16x512xf32>
    %147 = vector.shape_cast %146 : vector<1x16x512xf32> to vector<16x512xf32>
    %148 = arith.addf %147, %144 : vector<16x512xf32>
    %149 = vector.extract_strided_slice %148 {offsets = [0, 0], sizes = [16, 384], strides = [1, 1]} : vector<16x512xf32> to vector<16x384xf32>
    %150 = arith.negf %149 : vector<16x384xf32>
    %151 = math.exp %150 : vector<16x384xf32>
    %cst_84 = arith.constant 1.000000e+00 : f32
    %152 = vector.broadcast %cst_84 : f32 to vector<16x384xf32>
    %153 = arith.addf %152, %151 : vector<16x384xf32>
    %154 = arith.divf %152, %153 : vector<16x384xf32>
    %155 = vector.extract_strided_slice %154 {offsets = [0, 0], sizes = [16, 128], strides = [1, 1]} : vector<16x384xf32> to vector<16x128xf32>
    %156 = vector.extract_strided_slice %154 {offsets = [0, 128], sizes = [16, 128], strides = [1, 1]} : vector<16x384xf32> to vector<16x128xf32>
    %157 = vector.extract_strided_slice %154 {offsets = [0, 256], sizes = [16, 128], strides = [1, 1]} : vector<16x384xf32> to vector<16x128xf32>
    %158 = vector.extract_strided_slice %148 {offsets = [0, 384], sizes = [16, 128], strides = [1, 1]} : vector<16x512xf32> to vector<16x128xf32>
    %159 = math.tanh %158 : vector<16x128xf32>
    %160 = arith.mulf %156, %141 : vector<16x128xf32>
    %161 = arith.mulf %155, %159 : vector<16x128xf32>
    %162 = arith.addf %160, %161 : vector<16x128xf32>
    %163 = math.tanh %162 : vector<16x128xf32>
    %164 = arith.mulf %157, %163 : vector<16x128xf32>
    %c0_85 = arith.constant 0 : index
    %c0_86 = arith.constant 0 : index
    %165 = vector.load %arg8[%c0_85, %c0_86] : memref<16x128xf32, #tpu.memory_space<vmem>>, vector<16x128xf32>
    tpu.vector_store %arg8[%c0_85, %c0_86], %164 {strides = array<i32>} : memref<16x128xf32, #tpu.memory_space<vmem>>, vector<16x128xf32>,
    %c0_87 = arith.constant 0 : index
    %c0_88 = arith.constant 0 : index
    %166 = vector.load %arg9[%c0_87, %c0_88] : memref<16x128xf32, #tpu.memory_space<vmem>>, vector<16x128xf32>
    tpu.vector_store %arg9[%c0_87, %c0_88], %162 {strides = array<i32>} : memref<16x128xf32, #tpu.memory_space<vmem>>, vector<16x128xf32>,
    %167 = arith.truncf %164 : vector<16x128xf32> to vector<16x128xbf16>
    %168 = arith.index_cast %c4_i32 : i32 to index
    %c0_89 = arith.constant 0 : index
    %c0_90 = arith.constant 0 : index
    %169 = vector.load %arg6[%168, %c0_89, %c0_90] : memref<8x16x128xbf16, #tpu.memory_space<vmem>>, vector<1x16x128xbf16>
    %170 = vector.shape_cast %169 : vector<1x16x128xbf16> to vector<16x128xbf16>
    %171 = vector.shape_cast %167 : vector<16x128xbf16> to vector<1x16x128xbf16>
    tpu.vector_store %arg6[%168, %c0_89, %c0_90], %171 {strides = array<i32>} : memref<8x16x128xbf16, #tpu.memory_space<vmem>>, vector<1x16x128xbf16>,
    %c5_i32 = arith.constant 5 : i32
    %c0_91 = arith.constant 0 : index
    %c0_92 = arith.constant 0 : index
    %172 = vector.load %arg8[%c0_91, %c0_92] : memref<16x128xf32, #tpu.memory_space<vmem>>, vector<16x128xf32>
    %c0_93 = arith.constant 0 : index
    %c0_94 = arith.constant 0 : index
    %173 = vector.load %arg9[%c0_93, %c0_94] : memref<16x128xf32, #tpu.memory_space<vmem>>, vector<16x128xf32>
    %174 = arith.truncf %172 : vector<16x128xf32> to vector<16x128xbf16>
    %c0_95 = arith.constant 0 : index
    %c0_96 = arith.constant 0 : index
    %175 = vector.load %arg5[%c0_95, %c0_96] : memref<128x512xbf16, #tpu.memory_space<vmem>>, vector<128x512xbf16>
    %cst_97 = arith.constant dense<0.000000e+00> : vector<16x512xf32>
    %176 = tpu.matmul %174, %175, %cst_97 {dimension_numbers = #tpu.dot_dimension_numbers<[1], [0], [0], [1], [0, 0, 1, 1], [], []>} : vector<16x128xbf16>, vector<128x512xbf16>, vector<16x512xf32> -> vector<16x512xf32>
    %177 = arith.index_cast %c5_i32 : i32 to index
    %c0_98 = arith.constant 0 : index
    %c0_99 = arith.constant 0 : index
    %178 = vector.load %arg7[%177, %c0_98, %c0_99] : memref<8x16x512xf32, #tpu.memory_space<vmem>>, vector<1x16x512xf32>
    %179 = vector.shape_cast %178 : vector<1x16x512xf32> to vector<16x512xf32>
    %180 = arith.addf %179, %176 : vector<16x512xf32>
    %181 = vector.extract_strided_slice %180 {offsets = [0, 0], sizes = [16, 384], strides = [1, 1]} : vector<16x512xf32> to vector<16x384xf32>
    %182 = arith.negf %181 : vector<16x384xf32>
    %183 = math.exp %182 : vector<16x384xf32>
    %cst_100 = arith.constant 1.000000e+00 : f32
    %184 = vector.broadcast %cst_100 : f32 to vector<16x384xf32>
    %185 = arith.addf %184, %183 : vector<16x384xf32>
    %186 = arith.divf %184, %185 : vector<16x384xf32>
    %187 = vector.extract_strided_slice %186 {offsets = [0, 0], sizes = [16, 128], strides = [1, 1]} : vector<16x384xf32> to vector<16x128xf32>
    %188 = vector.extract_strided_slice %186 {offsets = [0, 128], sizes = [16, 128], strides = [1, 1]} : vector<16x384xf32> to vector<16x128xf32>
    %189 = vector.extract_strided_slice %186 {offsets = [0, 256], sizes = [16, 128], strides = [1, 1]} : vector<16x384xf32> to vector<16x128xf32>
    %190 = vector.extract_strided_slice %180 {offsets = [0, 384], sizes = [16, 128], strides = [1, 1]} : vector<16x512xf32> to vector<16x128xf32>
    %191 = math.tanh %190 : vector<16x128xf32>
    %192 = arith.mulf %188, %173 : vector<16x128xf32>
    %193 = arith.mulf %187, %191 : vector<16x128xf32>
    %194 = arith.addf %192, %193 : vector<16x128xf32>
    %195 = math.tanh %194 : vector<16x128xf32>
    %196 = arith.mulf %189, %195 : vector<16x128xf32>
    %c0_101 = arith.constant 0 : index
    %c0_102 = arith.constant 0 : index
    %197 = vector.load %arg8[%c0_101, %c0_102] : memref<16x128xf32, #tpu.memory_space<vmem>>, vector<16x128xf32>
    tpu.vector_store %arg8[%c0_101, %c0_102], %196 {strides = array<i32>} : memref<16x128xf32, #tpu.memory_space<vmem>>, vector<16x128xf32>,
    %c0_103 = arith.constant 0 : index
    %c0_104 = arith.constant 0 : index
    %198 = vector.load %arg9[%c0_103, %c0_104] : memref<16x128xf32, #tpu.memory_space<vmem>>, vector<16x128xf32>
    tpu.vector_store %arg9[%c0_103, %c0_104], %194 {strides = array<i32>} : memref<16x128xf32, #tpu.memory_space<vmem>>, vector<16x128xf32>,
    %199 = arith.truncf %196 : vector<16x128xf32> to vector<16x128xbf16>
    %200 = arith.index_cast %c5_i32 : i32 to index
    %c0_105 = arith.constant 0 : index
    %c0_106 = arith.constant 0 : index
    %201 = vector.load %arg6[%200, %c0_105, %c0_106] : memref<8x16x128xbf16, #tpu.memory_space<vmem>>, vector<1x16x128xbf16>
    %202 = vector.shape_cast %201 : vector<1x16x128xbf16> to vector<16x128xbf16>
    %203 = vector.shape_cast %199 : vector<16x128xbf16> to vector<1x16x128xbf16>
    tpu.vector_store %arg6[%200, %c0_105, %c0_106], %203 {strides = array<i32>} : memref<8x16x128xbf16, #tpu.memory_space<vmem>>, vector<1x16x128xbf16>,
    %c6_i32 = arith.constant 6 : i32
    %c0_107 = arith.constant 0 : index
    %c0_108 = arith.constant 0 : index
    %204 = vector.load %arg8[%c0_107, %c0_108] : memref<16x128xf32, #tpu.memory_space<vmem>>, vector<16x128xf32>
    %c0_109 = arith.constant 0 : index
    %c0_110 = arith.constant 0 : index
    %205 = vector.load %arg9[%c0_109, %c0_110] : memref<16x128xf32, #tpu.memory_space<vmem>>, vector<16x128xf32>
    %206 = arith.truncf %204 : vector<16x128xf32> to vector<16x128xbf16>
    %c0_111 = arith.constant 0 : index
    %c0_112 = arith.constant 0 : index
    %207 = vector.load %arg5[%c0_111, %c0_112] : memref<128x512xbf16, #tpu.memory_space<vmem>>, vector<128x512xbf16>
    %cst_113 = arith.constant dense<0.000000e+00> : vector<16x512xf32>
    %208 = tpu.matmul %206, %207, %cst_113 {dimension_numbers = #tpu.dot_dimension_numbers<[1], [0], [0], [1], [0, 0, 1, 1], [], []>} : vector<16x128xbf16>, vector<128x512xbf16>, vector<16x512xf32> -> vector<16x512xf32>
    %209 = arith.index_cast %c6_i32 : i32 to index
    %c0_114 = arith.constant 0 : index
    %c0_115 = arith.constant 0 : index
    %210 = vector.load %arg7[%209, %c0_114, %c0_115] : memref<8x16x512xf32, #tpu.memory_space<vmem>>, vector<1x16x512xf32>
    %211 = vector.shape_cast %210 : vector<1x16x512xf32> to vector<16x512xf32>
    %212 = arith.addf %211, %208 : vector<16x512xf32>
    %213 = vector.extract_strided_slice %212 {offsets = [0, 0], sizes = [16, 384], strides = [1, 1]} : vector<16x512xf32> to vector<16x384xf32>
    %214 = arith.negf %213 : vector<16x384xf32>
    %215 = math.exp %214 : vector<16x384xf32>
    %cst_116 = arith.constant 1.000000e+00 : f32
    %216 = vector.broadcast %cst_116 : f32 to vector<16x384xf32>
    %217 = arith.addf %216, %215 : vector<16x384xf32>
    %218 = arith.divf %216, %217 : vector<16x384xf32>
    %219 = vector.extract_strided_slice %218 {offsets = [0, 0], sizes = [16, 128], strides = [1, 1]} : vector<16x384xf32> to vector<16x128xf32>
    %220 = vector.extract_strided_slice %218 {offsets = [0, 128], sizes = [16, 128], strides = [1, 1]} : vector<16x384xf32> to vector<16x128xf32>
    %221 = vector.extract_strided_slice %218 {offsets = [0, 256], sizes = [16, 128], strides = [1, 1]} : vector<16x384xf32> to vector<16x128xf32>
    %222 = vector.extract_strided_slice %212 {offsets = [0, 384], sizes = [16, 128], strides = [1, 1]} : vector<16x512xf32> to vector<16x128xf32>
    %223 = math.tanh %222 : vector<16x128xf32>
    %224 = arith.mulf %220, %205 : vector<16x128xf32>
    %225 = arith.mulf %219, %223 : vector<16x128xf32>
    %226 = arith.addf %224, %225 : vector<16x128xf32>
    %227 = math.tanh %226 : vector<16x128xf32>
    %228 = arith.mulf %221, %227 : vector<16x128xf32>
    %c0_117 = arith.constant 0 : index
    %c0_118 = arith.constant 0 : index
    %229 = vector.load %arg8[%c0_117, %c0_118] : memref<16x128xf32, #tpu.memory_space<vmem>>, vector<16x128xf32>
    tpu.vector_store %arg8[%c0_117, %c0_118], %228 {strides = array<i32>} : memref<16x128xf32, #tpu.memory_space<vmem>>, vector<16x128xf32>,
    %c0_119 = arith.constant 0 : index
    %c0_120 = arith.constant 0 : index
    %230 = vector.load %arg9[%c0_119, %c0_120] : memref<16x128xf32, #tpu.memory_space<vmem>>, vector<16x128xf32>
    tpu.vector_store %arg9[%c0_119, %c0_120], %226 {strides = array<i32>} : memref<16x128xf32, #tpu.memory_space<vmem>>, vector<16x128xf32>,
    %231 = arith.truncf %228 : vector<16x128xf32> to vector<16x128xbf16>
    %232 = arith.index_cast %c6_i32 : i32 to index
    %c0_121 = arith.constant 0 : index
    %c0_122 = arith.constant 0 : index
    %233 = vector.load %arg6[%232, %c0_121, %c0_122] : memref<8x16x128xbf16, #tpu.memory_space<vmem>>, vector<1x16x128xbf16>
    %234 = vector.shape_cast %233 : vector<1x16x128xbf16> to vector<16x128xbf16>
    %235 = vector.shape_cast %231 : vector<16x128xbf16> to vector<1x16x128xbf16>
    tpu.vector_store %arg6[%232, %c0_121, %c0_122], %235 {strides = array<i32>} : memref<8x16x128xbf16, #tpu.memory_space<vmem>>, vector<1x16x128xbf16>,
    %c7_i32 = arith.constant 7 : i32
    %c0_123 = arith.constant 0 : index
    %c0_124 = arith.constant 0 : index
    %236 = vector.load %arg8[%c0_123, %c0_124] : memref<16x128xf32, #tpu.memory_space<vmem>>, vector<16x128xf32>
    %c0_125 = arith.constant 0 : index
    %c0_126 = arith.constant 0 : index
    %237 = vector.load %arg9[%c0_125, %c0_126] : memref<16x128xf32, #tpu.memory_space<vmem>>, vector<16x128xf32>
    %238 = arith.truncf %236 : vector<16x128xf32> to vector<16x128xbf16>
    %c0_127 = arith.constant 0 : index
    %c0_128 = arith.constant 0 : index
    %239 = vector.load %arg5[%c0_127, %c0_128] : memref<128x512xbf16, #tpu.memory_space<vmem>>, vector<128x512xbf16>
    %cst_129 = arith.constant dense<0.000000e+00> : vector<16x512xf32>
    %240 = tpu.matmul %238, %239, %cst_129 {dimension_numbers = #tpu.dot_dimension_numbers<[1], [0], [0], [1], [0, 0, 1, 1], [], []>} : vector<16x128xbf16>, vector<128x512xbf16>, vector<16x512xf32> -> vector<16x512xf32>
    %241 = arith.index_cast %c7_i32 : i32 to index
    %c0_130 = arith.constant 0 : index
    %c0_131 = arith.constant 0 : index
    %242 = vector.load %arg7[%241, %c0_130, %c0_131] : memref<8x16x512xf32, #tpu.memory_space<vmem>>, vector<1x16x512xf32>
    %243 = vector.shape_cast %242 : vector<1x16x512xf32> to vector<16x512xf32>
    %244 = arith.addf %243, %240 : vector<16x512xf32>
    %245 = vector.extract_strided_slice %244 {offsets = [0, 0], sizes = [16, 384], strides = [1, 1]} : vector<16x512xf32> to vector<16x384xf32>
    %246 = arith.negf %245 : vector<16x384xf32>
    %247 = math.exp %246 : vector<16x384xf32>
    %cst_132 = arith.constant 1.000000e+00 : f32
    %248 = vector.broadcast %cst_132 : f32 to vector<16x384xf32>
    %249 = arith.addf %248, %247 : vector<16x384xf32>
    %250 = arith.divf %248, %249 : vector<16x384xf32>
    %251 = vector.extract_strided_slice %250 {offsets = [0, 0], sizes = [16, 128], strides = [1, 1]} : vector<16x384xf32> to vector<16x128xf32>
    %252 = vector.extract_strided_slice %250 {offsets = [0, 128], sizes = [16, 128], strides = [1, 1]} : vector<16x384xf32> to vector<16x128xf32>
    %253 = vector.extract_strided_slice %250 {offsets = [0, 256], sizes = [16, 128], strides = [1, 1]} : vector<16x384xf32> to vector<16x128xf32>
    %254 = vector.extract_strided_slice %244 {offsets = [0, 384], sizes = [16, 128], strides = [1, 1]} : vector<16x512xf32> to vector<16x128xf32>
    %255 = math.tanh %254 : vector<16x128xf32>
    %256 = arith.mulf %252, %237 : vector<16x128xf32>
    %257 = arith.mulf %251, %255 : vector<16x128xf32>
    %258 = arith.addf %256, %257 : vector<16x128xf32>
    %259 = math.tanh %258 : vector<16x128xf32>
    %260 = arith.mulf %253, %259 : vector<16x128xf32>
    %c0_133 = arith.constant 0 : index
    %c0_134 = arith.constant 0 : index
    %261 = vector.load %arg8[%c0_133, %c0_134] : memref<16x128xf32, #tpu.memory_space<vmem>>, vector<16x128xf32>
    tpu.vector_store %arg8[%c0_133, %c0_134], %260 {strides = array<i32>} : memref<16x128xf32, #tpu.memory_space<vmem>>, vector<16x128xf32>,
    %c0_135 = arith.constant 0 : index
    %c0_136 = arith.constant 0 : index
    %262 = vector.load %arg9[%c0_135, %c0_136] : memref<16x128xf32, #tpu.memory_space<vmem>>, vector<16x128xf32>
    tpu.vector_store %arg9[%c0_135, %c0_136], %258 {strides = array<i32>} : memref<16x128xf32, #tpu.memory_space<vmem>>, vector<16x128xf32>,
    %263 = arith.truncf %260 : vector<16x128xf32> to vector<16x128xbf16>
    %264 = arith.index_cast %c7_i32 : i32 to index
    %c0_137 = arith.constant 0 : index
    %c0_138 = arith.constant 0 : index
    %265 = vector.load %arg6[%264, %c0_137, %c0_138] : memref<8x16x128xbf16, #tpu.memory_space<vmem>>, vector<1x16x128xbf16>
    %266 = vector.shape_cast %265 : vector<1x16x128xbf16> to vector<16x128xbf16>
    %267 = vector.shape_cast %263 : vector<16x128xbf16> to vector<1x16x128xbf16>
    tpu.vector_store %arg6[%264, %c0_137, %c0_138], %267 {strides = array<i32>} : memref<8x16x128xbf16, #tpu.memory_space<vmem>>, vector<1x16x128xbf16>,
    %c8_i32 = arith.constant 8 : i32
    return
  }
  func.func @transform_0(%arg0: i32, %arg1: i32) -> (i32, i32, i32) {
    %c0_i32 = arith.constant 0 : i32
    %c0_i32_0 = arith.constant 0 : i32
    return %arg1, %arg0, %c0_i32 : i32, i32, i32
  }
  func.func @transform_1(%arg0: i32, %arg1: i32) -> (i32, i32) {
    %c0_i32 = arith.constant 0 : i32
    %c0_i32_0 = arith.constant 0 : i32
    %c0_i32_1 = arith.constant 0 : i32
    return %c0_i32, %c0_i32_0 : i32, i32
  }
  func.func @transform_2(%arg0: i32, %arg1: i32) -> (i32, i32) {
    %c0_i32 = arith.constant 0 : i32
    %c0_i32_0 = arith.constant 0 : i32
    %c0_i32_1 = arith.constant 0 : i32
    return %c0_i32, %c0_i32_0 : i32, i32
  }
  func.func @transform_3(%arg0: i32, %arg1: i32) -> (i32, i32) {
    %c0_i32 = arith.constant 0 : i32
    %c0_i32_0 = arith.constant 0 : i32
    %c0_i32_1 = arith.constant 0 : i32
    return %c0_i32, %c0_i32_0 : i32, i32
  }
  func.func @transform_4(%arg0: i32, %arg1: i32) -> (i32, i32, i32) {
    %c0_i32 = arith.constant 0 : i32
    %c0_i32_0 = arith.constant 0 : i32
    return %arg1, %arg0, %c0_i32 : i32, i32, i32
  }
}

</mosaic_0001>

<bundles_post_ra>
// kernel: tpu_custom_call.1
= control target key start
LH: loop header
LB: loop body
LE: loop exit
PB: predicated region body
PF: predicated region fallthrough
CT: control target
= control target key end

     0   :  { %9 = vsyncpa [#allocation6], 0  ;;  %s5067_s0 = inlined_call_operand.hbm [shape: bf16[8,16,16], index: 0, kind: input, shape index: {}]   ;;  %s5068_s1 = inlined_call_operand.hbm [shape: bf16[16,512], index: 1, kind: input, shape index: {}]   ;;  %s5069_s2 = inlined_call_operand.vmem [shape: f32[1,512], index: 2, kind: input, shape index: {}]   ;;  %s5070_s3 = inlined_call_operand.hbm [shape: bf16[128,512], index: 3, kind: input, shape index: {}]   ;;  %s5071_s4 = inlined_call_operand.hbm [shape: bf16[8,16,128], index: 4, kind: output, shape index: {}]  }
   0x1   :  { %10 = vsyncpa [#allocation9], 0 }
   0x2   :  { %11 = vsyncpa [#allocation7], 0  ;;  %s4413_s15 = smov [#allocation8]   ;;  %s4319_s19 = scalar_lea.hbm %s5068_s1, 512 }
   0x3   :  { %s29_s16 = sshll.u32 %s4413_s15, 4  ;;  %p4320_p0 = scmp.ne.s32.totalorder %s5068_s1, %s4319_s19  ;;  %s30_s16 = int_to_ptr.vmem [resolvable:$true] %s29_s16 }
   0x4   :  { %p4323_p1 = scmp.lt.u32.totalorder %s4319_s19, %s5068_s1 }
   0x6   :  { %p4325_p2 = pnand %p4323_p1, %p4320_p0 }
   0x8   :  { %4328 = shalt.err (!%p4325_p2)
}
   0x9   :  { %s4329_s24 = scalar_lea.vmem %s30_s16, 512  ;;  %p4334_p4 = scmp.lt.s32.totalorder %s30_s16, %s30_s16 }
   0xa   :  { %p4330_p3 = scmp.ne.s32.totalorder %s30_s16, %s4329_s24  ;;  %p4335_p5 = scmp.lt.s32.totalorder %s4329_s24, %s4329_s24 }
   0xc   :  { %p4336_p6 = por %p4335_p5, %p4334_p4 }
   0xe   :  { %p4337_p7 = pnand %p4336_p6, %p4330_p3 }
  0x10   :  { %4340 = shalt.err (!%p4337_p7)
}
  0x11   :  { %s4414_s25 = smov 256   ;;  %s4415_s26 = smov 16  }
  0x12   :  { %35 = dma.hbm_to_vmem [thread:$0]  %s5068_s1, 512, %s30_s16, [#allocation9], %s4414_s25, %s4414_s25, %s4415_s26  }
  0x13   :  { %s4416_s29 = smov [#allocation5]   ;;  %s4341_s7 = scalar_lea.hbm %s5067_s0, 1024 }
  0x14   :  { %s17_s30 = sshll.u32 %s4416_s29, 4  ;;  %p4342_p8 = scmp.ne.s32.totalorder %s5067_s0, %s4341_s7  ;;  %s18_s30 = int_to_ptr.vmem [resolvable:$true] %s17_s30 }
  0x15   :  { %p4345_p9 = scmp.lt.u32.totalorder %s4341_s7, %s5067_s0 }
  0x17   :  { %p4347_p10 = pnand %p4345_p9, %p4342_p8 }
  0x19   :  { %4350 = shalt.err (!%p4347_p10)
}
  0x1a   :  { %s4351_s12 = scalar_lea.vmem %s18_s30, 1024  ;;  %p4356_p12 = scmp.lt.s32.totalorder %s18_s30, %s18_s30 }
  0x1b   :  { %p4352_p11 = scmp.ne.s32.totalorder %s18_s30, %s4351_s12  ;;  %p4357_p13 = scmp.lt.s32.totalorder %s4351_s12, %s4351_s12 }
  0x1d   :  { %p4358_p0 = por %p4357_p13, %p4356_p12 }
  0x1f   :  { %p4359_p1 = pnand %p4358_p0, %p4352_p11 }
  0x21   :  { %4362 = shalt.err (!%p4359_p1)
}
  0x22   :  { %s4417_s1 = smov 64   ;;  %s4418_s13 = smov 4  }
  0x23   :  { %23 = dma.hbm_to_vmem [thread:$0]  %s5067_s0, 1024, %s18_s30, [#allocation6], %s4417_s1, %s4417_s1, %s4418_s13  }
  0x24   :  { %s4419_s16 = smov [#allocation10]   ;;  %s4363_s20 = scalar_lea.hbm %s5070_s3, 4096 }
  0x25   :  { %s43_s17 = sshll.u32 %s4419_s16, 4  ;;  %p4364_p2 = scmp.ne.s32.totalorder %s5070_s3, %s4363_s20  ;;  %s44_s17 = int_to_ptr.vmem [resolvable:$true] %s43_s17 }
  0x26   :  { %p4367_p3 = scmp.lt.u32.totalorder %s4363_s20, %s5070_s3 }
  0x28   :  { %p4369_p4 = pnand %p4367_p3, %p4364_p2 }
  0x2a   :  { %4372 = shalt.err (!%p4369_p4)
}
  0x2b   :  { %s4373_s27 = scalar_lea.vmem %s44_s17, 4096  ;;  %p4378_p6 = scmp.lt.s32.totalorder %s44_s17, %s44_s17 }
  0x2c   :  { %p4374_p5 = scmp.ne.s32.totalorder %s44_s17, %s4373_s27  ;;  %p4379_p7 = scmp.lt.s32.totalorder %s4373_s27, %s4373_s27 }
  0x2e   :  { %p4380_p8 = por %p4379_p7, %p4378_p6 }
  0x30   :  { %p4381_p9 = pnand %p4380_p8, %p4374_p5 }
  0x32   :  { %4384 = shalt.err (!%p4381_p9)
}
  0x33   :  { %49 = dma.hbm_to_vmem [thread:$0]  %s5070_s3, 4096, %s44_s17, [#allocation9], %s4414_s25, %s4414_s25, %s4415_s26  }
  0x34   :  { %4407 = dma.done.wait [#allocation6], 1024  }
  0x35   :  { %4408 = vsyncadd [#allocation6], 4294966272 }
  0x36   :  { %4409 = dma.done.wait [#allocation9], 4608  }
  0x37   :  { %4410 = vsyncadd [#allocation9], 4294962688  ;;  %v4420_v0 = vmov 0   ;;  %v3947_v1 = vld [vmem:[#allocation8 + $0x4] ss:$16 sps:$4 sm:$0xff]   ;;  %vm170_vm0 = vcmask 130048   ;;  %v90_v46 = vlaneseq }
  0x38   :  { %227 = vmatprep.mubr.bf16.mxu0 %v4420_v0  ;;  %340 = vmatprep.mubr.bf16.mxu1 %v4420_v0  ;;  %v3949_v2 = vld [vmem:[#allocation8 + $0xc] ss:$16 sps:$4 sm:$0xff]   ;;  %v3951_v3 = vld [vmem:[#allocation8] ss:$16 sps:$4 sm:$0xff]   ;;  %v3952_v4 = vld [vmem:[#allocation8 + $0x8] ss:$16 sps:$4 sm:$0xff]  }
  0x39   :  { %195 = vmatprep.subr.bf16.mxu0 %v3947_v1  ;;  %308 = vmatprep.subr.bf16.mxu1 %v3949_v2  ;;  %v3953_v5 = vld [vmem:[#allocation5] sm:$0xff]   ;;  %v4508_v10 = vld [vmem:[#allocation10 + $0x8] ss:$16 sps:$4 sm:$0xff]   ;;  %v4510_v11 = vld [vmem:[#allocation10 + $0xc] ss:$16 sps:$4 sm:$0xff]   ;;  %v4421_v45 = vmov 0.0|0.0  }
  0x3a   :  { %196 = vmatpush1.bf16.msra.mxu0 %v3951_v3  ;;  %309 = vmatpush1.bf16.msra.mxu1 %v3952_v4  ;;  %v4495_v6 = vld [vmem:[#allocation10] ss:$16 sps:$4 sm:$0xff]   ;;  %v4497_v7 = vld [vmem:[#allocation10 + $0x4] ss:$16 sps:$4 sm:$0xff]   ;;  %v3957_v12 = vld [vmem:[#allocation5 + $0x8] sm:$0xff]   ;;  %v91_v47 = vshrl.u32 %v90_v46, 7 }
  0x3b   :  { %682 = vmatprep.subr.bf16.mxu0 %v4497_v7  ;;  %v4500_v8 = vld [vmem:[#allocation10 + $0x20] ss:$16 sps:$4 sm:$0xff]   ;;  %v4504_v9 = vld [vmem:[#allocation10 + $0x24] ss:$16 sps:$4 sm:$0xff]   ;;  %725 = vmatprep.subr.bf16.mxu1 %v4510_v11  ;;  %v4521_v15 = vld [vmem:[#allocation10 + $0x2c] ss:$16 sps:$4 sm:$0xff]  }
  0x3c   :  { %v4515_v13 = vld [vmem:[#allocation10 + $0x44] ss:$16 sps:$4 sm:$0xff]   ;;  %v4517_v14 = vld [vmem:[#allocation10 + $0x40] ss:$16 sps:$4 sm:$0xff]   ;;  %v4524_v16 = vld [vmem:[#allocation10 + $0x28] ss:$16 sps:$4 sm:$0xff]  }
  0x3d   :  { %3417 = vmatmul.mubr.msk.bf16.vlgmr.msra.gmra.mrb[0].mxu0 %vm170_vm0, %v3953_v5  ;;  %3425 = vmatmul.mubr.msk.bf16.vlgmr.msra.gmra.mrb[0].mxu1 %vm170_vm0, %v3953_v5  ;;  %v4527_v17 = vld [vmem:[#allocation10 + $0x64] ss:$16 sps:$4 sm:$0xff]   ;;  %v4531_v18 = vld [vmem:[#allocation10 + $0x4c] ss:$16 sps:$4 sm:$0xff]   ;;  %v4535_v19 = vld [vmem:[#allocation10 + $0x60] ss:$16 sps:$4 sm:$0xff]  }
  0x3e   :  { %683 = vmatpush1.bf16.msra.mxu0 %v4495_v6  ;;  %237 = vmatprep.mubr.bf16.mxu0 %v4420_v0  ;;  %v4539_v20 = vld [vmem:[#allocation10 + $0x48] ss:$16 sps:$4 sm:$0xff]   ;;  %v4543_v21 = vld [vmem:[#allocation10 + $0x84] ss:$16 sps:$4 sm:$0xff]   ;;  %v4545_v23 = vld [vmem:[#allocation10 + $0x6c] ss:$16 sps:$4 sm:$0xff]  }
  0x3f   :  { %350 = vmatprep.mubr.bf16.mxu1 %v4420_v0  ;;  %684 = vmatprep.subr.bf16.mxu0 %v4504_v9  ;;  %v3964_v22 = vld [vmem:[#allocation5 + $0x10] sm:$0xff]   ;;  %v4551_v25 = vld [vmem:[#allocation10 + $0x68] ss:$16 sps:$4 sm:$0xff]   ;;  %v4559_v27 = vld [vmem:[#allocation10 + $0x8c] ss:$16 sps:$4 sm:$0xff]   ;;  %v92_v48 = vsub.s32 0, %v91_v47 }
  0x40   :  { %726 = vmatpush1.bf16.msra.mxu1 %v4508_v10  ;;  %v4548_v24 = vld [vmem:[#allocation10 + $0x80] ss:$16 sps:$4 sm:$0xff]   ;;  %v4555_v26 = vld [vmem:[#allocation10 + $0xa4] ss:$16 sps:$4 sm:$0xff]   ;;  %v4567_v29 = vld [vmem:[#allocation10 + $0x88] ss:$16 sps:$4 sm:$0xff]  }
  0x41   :  { %727 = vmatprep.subr.bf16.mxu1 %v4521_v15  ;;  %v4564_v28 = vld [vmem:[#allocation10 + $0xa0] ss:$16 sps:$4 sm:$0xff]   ;;  %v4571_v30 = vld [vmem:[#allocation10 + $0xc4] ss:$16 sps:$4 sm:$0xff]   ;;  %v4573_v31 = vld [vmem:[#allocation10 + $0xac] ss:$16 sps:$4 sm:$0xff]  }
  0x42   :  { %685 = vmatpush1.bf16.msra.mxu0 %v4500_v8  ;;  %v3971_v32 = vld [vmem:[#allocation5 + $0x18] sm:$0xff]   ;;  %v4575_v33 = vld [vmem:[#allocation10 + $0xc0] ss:$16 sps:$4 sm:$0xff]   ;;  %v4583_v35 = vld [vmem:[#allocation10 + $0xe4] ss:$16 sps:$4 sm:$0xff]   ;;  %v96_v50 = vsub.s32 1, %v91_v47 }
  0x43   :  { %686 = vmatprep.subr.bf16.mxu0 %v4515_v13  ;;  %v4579_v34 = vld [vmem:[#allocation10 + $0xa8] ss:$16 sps:$4 sm:$0xff]   ;;  %v4585_v36 = vld [vmem:[#allocation10 + $0xcc] ss:$16 sps:$4 sm:$0xff]   ;;  %v4589_v37 = vld [vmem:[#allocation10 + $0xe0] ss:$16 sps:$4 sm:$0xff]  }
  0x44   :  { %728 = vmatpush1.bf16.msra.mxu1 %v4524_v16  ;;  %v4591_v38 = vld [vmem:[#allocation10 + $0xc8] ss:$16 sps:$4 sm:$0xff]   ;;  %v4595_v39 = vld [vmem:[#allocation10 + $0xec] ss:$16 sps:$4 sm:$0xff]   ;;  %v3978_v40 = vld [vmem:[#allocation5 + $0x20] sm:$0xff]   ;;  %v100_v54 = vsub.s32 2, %v91_v47 }
  0x45   :  { %3418 = vmatmul.mubr.msk.bf16.gmra.mrb[4].mxu0 %vm170_vm0, %v3957_v12  ;;  %3426 = vmatmul.mubr.msk.bf16.gmra.mrb[4].mxu1 %vm170_vm0, %v3957_v12  ;;  %v4601_v41 = vld [vmem:[#allocation10 + $0xe8] ss:$16 sps:$4 sm:$0xff]   ;;  %v3992_v43 = vld [vmem:[#allocation5 + $0x30] sm:$0xff]   ;;  %v88_v49 = vld [vmem:[%s5069_s2] sm:$0xf]  ;;  %v104_v63 = vsub.s32 3, %v91_v47 }
  0x46   :  { %247 = vmatprep.mubr.bf16.mxu0 %v4420_v0  ;;  %360 = vmatprep.mubr.bf16.mxu1 %v4420_v0  ;;  %v3985_v42 = vld [vmem:[#allocation5 + $0x28] sm:$0xff]   ;;  %v3999_v44 = vld [vmem:[#allocation5 + $0x38] sm:$0xff]   ;;  %v4662_v51 = vrot.slane %v88_v49, %v92_v48  ;;  %v4664_v52 = vrot.slane %v88_v49, %v96_v50  ;;  %v4669_v4 = vrot.slane %v88_v49, %v100_v54  ;;  %s4422_s2 = smov [#allocation11]  }
  0x47   :  { %687 = vmatpush1.bf16.msra.mxu0 %v4517_v14  ;;  %729 = vmatprep.subr.bf16.mxu1 %v4531_v18  ;;  %s3392_s26 = sshll.u32 %s4422_s2, 4  ;;  %s3393_s26 = int_to_ptr.vmem [resolvable:$true] %s3392_s26 }
  0x48   :  { %688 = vmatprep.subr.bf16.mxu0 %v4527_v17  ;;  %730 = vmatpush1.bf16.msra.mxu1 %v4539_v20  ;;  %s4385_s29 = scalar_lea.vmem %s3393_s26, 1024  ;;  %p4390_p11 = scmp.lt.s32.totalorder %s3393_s26, %s3393_s26 }
  0x49   :  { %731 = vmatprep.subr.bf16.mxu1 %v4545_v23  ;;  %p4386_p10 = scmp.ne.s32.totalorder %s3393_s26, %s4385_s29  ;;  %p4391_p12 = scmp.lt.s32.totalorder %s4385_s29, %s4385_s29 }
  0x4b   :  { %689 = vmatpush1.bf16.msra.mxu0 %v4535_v19  ;;  %p4392_p13 = por %p4391_p12, %p4390_p11 }
  0x4c   :  { %690 = vmatprep.subr.bf16.mxu0 %v4543_v21  ;;  %732 = vmatpush1.bf16.msra.mxu1 %v4551_v25 }
  0x4d   :  { %3419 = vmatmul.mubr.msk.bf16.gmra.mrb[8].mxu0 %vm170_vm0, %v3964_v22  ;;  %3427 = vmatmul.mubr.msk.bf16.gmra.mrb[8].mxu1 %vm170_vm0, %v3964_v22  ;;  %p4393_p0 = pnand %p4392_p13, %p4386_p10 }
  0x4e   :  { %257 = vmatprep.mubr.bf16.mxu0 %v4420_v0  ;;  %370 = vmatprep.mubr.bf16.mxu1 %v4420_v0 }
  0x4f   :  { %691 = vmatpush1.bf16.msra.mxu0 %v4548_v24  ;;  %733 = vmatprep.subr.bf16.mxu1 %v4559_v27 }
  0x50   :  { %692 = vmatprep.subr.bf16.mxu0 %v4555_v26  ;;  %734 = vmatpush1.bf16.msra.mxu1 %v4567_v29 }
  0x51   :  { %735 = vmatprep.subr.bf16.mxu1 %v4573_v31 }
  0x53   :  { %693 = vmatpush1.bf16.msra.mxu0 %v4564_v28 }
  0x54   :  { %694 = vmatprep.subr.bf16.mxu0 %v4571_v30  ;;  %736 = vmatpush1.bf16.msra.mxu1 %v4579_v34 }
  0x55   :  { %3420 = vmatmul.mubr.msk.bf16.gmra.mrb[12].mxu0 %vm170_vm0, %v3971_v32  ;;  %3428 = vmatmul.mubr.msk.bf16.gmra.mrb[12].mxu1 %vm170_vm0, %v3971_v32  ;;  %v4672_v32 = vrot.slane %v88_v49, %v104_v63 }
  0x56   :  { %267 = vmatprep.mubr.bf16.mxu0 %v4420_v0  ;;  %380 = vmatprep.mubr.bf16.mxu1 %v4420_v0 }
  0x57   :  { %695 = vmatpush1.bf16.msra.mxu0 %v4575_v33  ;;  %737 = vmatprep.subr.bf16.mxu1 %v4585_v36 }
  0x58   :  { %696 = vmatprep.subr.bf16.mxu0 %v4583_v35  ;;  %738 = vmatpush1.bf16.msra.mxu1 %v4591_v38 }
  0x59   :  { %739 = vmatprep.subr.bf16.mxu1 %v4595_v39 }
  0x5b   :  { %697 = vmatpush1.bf16.msra.mxu0 %v4589_v37 }
  0x5c   :  { %1043 = vmatprep.subr.bf16.mxu0 %v4497_v7  ;;  %740 = vmatpush1.bf16.msra.mxu1 %v4601_v41 }
  0x5d   :  { %3421 = vmatmul.mubr.msk.bf16.gmra.mrb[16].mxu0 %vm170_vm0, %v3978_v40  ;;  %3429 = vmatmul.mubr.msk.bf16.gmra.mrb[16].mxu1 %vm170_vm0, %v3978_v40 }
  0x5e   :  { %277 = vmatprep.mubr.bf16.mxu0 %v4420_v0  ;;  %390 = vmatprep.mubr.bf16.mxu1 %v4420_v0 }
  0x5f   :  { %1086 = vmatprep.subr.bf16.mxu1 %v4510_v11 }
  0x65   :  { %3422 = vmatmul.mubr.msk.bf16.gmra.mrb[20].mxu0 %vm170_vm0, %v3985_v42  ;;  %3430 = vmatmul.mubr.msk.bf16.gmra.mrb[20].mxu1 %vm170_vm0, %v3985_v42 }
  0x66   :  { %287 = vmatprep.mubr.bf16.mxu0 %v4420_v0  ;;  %400 = vmatprep.mubr.bf16.mxu1 %v4420_v0 }
  0x6d   :  { %3423 = vmatmul.mubr.msk.bf16.gmra.mrb[24].mxu0 %vm170_vm0, %v3992_v43  ;;  %3431 = vmatmul.mubr.msk.bf16.gmra.mrb[24].mxu1 %vm170_vm0, %v3992_v43 }
  0x6e   :  { %297 = vmatprep.mubr.bf16.mxu0 %v4420_v0  ;;  %410 = vmatprep.mubr.bf16.mxu1 %v4420_v0 }
  0x75   :  { %3424 = vmatmul.mubr.msk.bf16.gmra.mrb[28].mxu0 %vm170_vm0, %v3999_v44  ;;  %3432 = vmatmul.mubr.msk.bf16.gmra.mrb[28].mxu1 %vm170_vm0, %v3999_v44 }
  0x76   :  { %714 = vmatprep.mubr.bf16.mxu0 %v4420_v0  ;;  %757 = vmatprep.mubr.bf16.mxu1 %v4420_v0 }
  0x7d   :  { %715 = vmatmul.mubr.bf16.vlgmr.msra.gmra.mrb[0].mxu0 %v4421_v45  ;;  %758 = vmatmul.mubr.bf16.vlgmr.msra.gmra.mrb[0].mxu1 %v4421_v45 }
  0x7e   :  { %1044 = vmatpush1.bf16.msra.mxu0 %v4495_v6  ;;  %1087 = vmatpush1.bf16.msra.mxu1 %v4508_v10 }
  0x7f   :  { %1045 = vmatprep.subr.bf16.mxu0 %v4504_v9  ;;  %1088 = vmatprep.subr.bf16.mxu1 %v4521_v15 }
  0x80   :  { %1075 = vmatprep.mubr.bf16.mxu0 %v4420_v0  ;;  %1118 = vmatprep.mubr.bf16.mxu1 %v4420_v0 }
  0x82   :  { %1046 = vmatpush1.bf16.msra.mxu0 %v4500_v8  ;;  %1089 = vmatpush1.bf16.msra.mxu1 %v4524_v16 }
  0x83   :  { %1047 = vmatprep.subr.bf16.mxu0 %v4515_v13  ;;  %1090 = vmatprep.subr.bf16.mxu1 %v4531_v18 }
  0x86   :  { %1048 = vmatpush1.bf16.msra.mxu0 %v4517_v14  ;;  %1091 = vmatpush1.bf16.msra.mxu1 %v4539_v20 }
  0x87   :  { %1049 = vmatprep.subr.bf16.mxu0 %v4527_v17  ;;  %1092 = vmatprep.subr.bf16.mxu1 %v4545_v23 }
  0x8a   :  { %1050 = vmatpush1.bf16.msra.mxu0 %v4535_v19  ;;  %1093 = vmatpush1.bf16.msra.mxu1 %v4551_v25 }
  0x8b   :  { %1051 = vmatprep.subr.bf16.mxu0 %v4543_v21  ;;  %1094 = vmatprep.subr.bf16.mxu1 %v4559_v27 }
  0x8e   :  { %1052 = vmatpush1.bf16.msra.mxu0 %v4548_v24  ;;  %1095 = vmatpush1.bf16.msra.mxu1 %v4567_v29 }
  0x8f   :  { %1053 = vmatprep.subr.bf16.mxu0 %v4555_v26  ;;  %1096 = vmatprep.subr.bf16.mxu1 %v4573_v31 }
  0x92   :  { %1054 = vmatpush1.bf16.msra.mxu0 %v4564_v28  ;;  %1097 = vmatpush1.bf16.msra.mxu1 %v4579_v34 }
  0x93   :  { %1055 = vmatprep.subr.bf16.mxu0 %v4571_v30  ;;  %1098 = vmatprep.subr.bf16.mxu1 %v4585_v36 }
  0x96   :  { %1056 = vmatpush1.bf16.msra.mxu0 %v4575_v33  ;;  %1099 = vmatpush1.bf16.msra.mxu1 %v4591_v38 }
  0x97   :  { %1057 = vmatprep.subr.bf16.mxu0 %v4583_v35  ;;  %1100 = vmatprep.subr.bf16.mxu1 %v4595_v39 }
  0x9a   :  { %1058 = vmatpush1.bf16.msra.mxu0 %v4589_v37  ;;  %1101 = vmatpush1.bf16.msra.mxu1 %v4601_v41 }
  0x9b   :  { %1406 = vmatprep.subr.bf16.mxu0 %v4497_v7  ;;  %1449 = vmatprep.subr.bf16.mxu1 %v4510_v11 }
 0x150   :  { %v716_v53 = vpop.f32.mrb[0].mxu0  ;;  %v759_v55 = vpop.f32.mrb[0].mxu1 }
 0x151   :  { %v3809_v56 = vadd.f32 %v716_v53, %v4662_v51  ;;  %v718_v57 = vpop.f32.mrb[1].mxu0  ;;  %v761_v58 = vpop.f32.mrb[1].mxu1  ;;  %v3841_v40 = vadd.f32 %v759_v55, %v4669_v4 }
 0x152   :  { %v3810_v59 = vadd.f32 %v718_v57, %v4664_v52  ;;  %v720_v60 = vpop.f32.mrb[2].mxu0  ;;  %v763_v61 = vpop.f32.mrb[2].mxu1  ;;  %v3842_v43 = vadd.f32 %v761_v58, %v4672_v32 }
 0x153   :  { %v3465_v62 = vmul.f32 -1.442695, %v3809_v56  ;;  %v3811_v1 = vadd.f32 %v720_v60, %v4662_v51  ;;  %v722_v2 = vpop.f32.mrb[3].mxu0  ;;  %v765_v3 = vpop.f32.mrb[3].mxu1  ;;  %v3843_v42 = vadd.f32 %v763_v61, %v4669_v4  ;;  %v3467_v44 = vmul.f32 -1.442695, %v3841_v40 }
 0x154   :  { %v3466_v5 = vmul.f32 -1.442695, %v3810_v59  ;;  %v3812_v7 = vadd.f32 %v722_v2, %v4664_v52  ;;  %v3844_v47 = vadd.f32 %v765_v3, %v4672_v32 }
 0x155   :  { %4063 = vpow2.f32 %v3465_v62  ;;  %v3468_v12 = vmul.f32 -1.442695, %v3811_v1  ;;  %v3470_v45 = vmul.f32 -1.442695, %v3843_v42 }
 0x156   :  { %v3469_v22 = vmul.f32 -1.442695, %v3812_v7  ;;  %4065 = vpow2.f32 %v3466_v5 }
 0x157   :  { %4067 = vpow2.f32 %v3468_v12 }
 0x158   :  { %4069 = vpow2.f32 %v3469_v22 }
 0x159   :  { %4071 = vtanh.f32 %v3842_v43 }
 0x15a   :  { %4073 = vpow2.f32 %v3467_v44 }
 0x15b   :  { %4075 = vpow2.f32 %v3470_v45 }
 0x15f   :  { %v4064_v46 = vpop.eup %4063 }
 0x160   :  { %v802_v48 = vadd.f32 1.0, %v4064_v46  ;;  %v4066_v50 = vpop.eup %4065 }
 0x161   :  { %v4068_v49 = vpop.eup %4067  ;;  %v803_v53 = vadd.f32 1.0, %v4066_v50 }
 0x162   :  { %4077 = vrcp.f32 %v802_v48  ;;  %v805_v54 = vadd.f32 1.0, %v4068_v49  ;;  %v4070_v55 = vpop.eup %4069 }
 0x163   :  { %4079 = vtanh.f32 %v3844_v47  ;;  %v806_v56 = vadd.f32 1.0, %v4070_v55  ;;  %v4072_v57 = vpop.eup %4071 }
 0x164   :  { %4081 = vrcp.f32 %v803_v53  ;;  %v4074_v58 = vpop.eup %4073 }
 0x165   :  { %4083 = vrcp.f32 %v805_v54  ;;  %v4076_v59 = vpop.eup %4075  ;;  %v804_v2 = vadd.f32 1.0, %v4074_v58 }
 0x166   :  { %4085 = vrcp.f32 %v806_v56  ;;  %v807_v22 = vadd.f32 1.0, %v4076_v59 }
 0x167   :  { %4087 = vrcp.f32 %v804_v2 }
 0x16c   :  { %v4078_v60 = vpop.eup %4077 }
 0x16d   :  { %v4080_v61 = vpop.eup %4079  ;;  %v824_v62 = vmul.f32 %v4078_v60, %v4072_v57 }
 0x16e   :  { %v4082_v63 = vpop.eup %4081 }
 0x16f   :  { %v4084_v1 = vpop.eup %4083  ;;  %v822_v3 = vmul.f32 0.0, %v4082_v63 }
 0x170   :  { %v825_v5 = vmul.f32 %v4084_v1, %v4080_v61  ;;  %v4086_v7 = vpop.eup %4085 }
 0x171   :  { %v4678_v12 = vadd.f32 %v824_v62, %v822_v3  ;;  %v823_v40 = vmul.f32 0.0, %v4086_v7  ;;  %v4088_v43 = vpop.eup %4087 }
 0x173   :  { %4089 = vtanh.f32 %v4678_v12  ;;  %v4681_v42 = vadd.f32 %v825_v5, %v823_v40 }
 0x174   :  { %4091 = vrcp.f32 %v807_v22 }
 0x175   :  { %4093 = vtanh.f32 %v4681_v42 }
 0x17d   :  { %v4090_v44 = vpop.eup %4089 }
 0x17e   :  { %v4092_v45 = vpop.eup %4091  ;;  %v830_v47 = vmul.f32 %v4090_v44, %v4088_v43 }
 0x17f   :  { %v4094_v46 = vpop.eup %4093 }
 0x180   :  { %v831_v48 = vmul.f32 %v4094_v46, %v4092_v45 }
 0x182   :  { %v3772_v50 = vpack.c.bf16 %v831_v48, %v830_v47 }
 0x184   :  { %3773 = vst [vmem:[#allocation11] sm:$0xff] %v3772_v50   ;;  %1076 = vmatmul.mubr.bf16.vlgmr.msra.gmra.mrb[4].mxu0 %v3772_v50  ;;  %1119 = vmatmul.mubr.bf16.vlgmr.msra.gmra.mrb[4].mxu1 %v3772_v50 }
 0x185   :  { %1407 = vmatpush1.bf16.msra.mxu0 %v4495_v6  ;;  %1450 = vmatpush1.bf16.msra.mxu1 %v4508_v10 }
 0x186   :  { %1408 = vmatprep.subr.bf16.mxu0 %v4504_v9  ;;  %1451 = vmatprep.subr.bf16.mxu1 %v4521_v15 }
 0x187   :  { %1438 = vmatprep.mubr.bf16.mxu0 %v4420_v0  ;;  %1481 = vmatprep.mubr.bf16.mxu1 %v4420_v0 }
 0x189   :  { %1409 = vmatpush1.bf16.msra.mxu0 %v4500_v8  ;;  %1452 = vmatpush1.bf16.msra.mxu1 %v4524_v16 }
 0x18a   :  { %1410 = vmatprep.subr.bf16.mxu0 %v4515_v13  ;;  %1453 = vmatprep.subr.bf16.mxu1 %v4531_v18 }
 0x18d   :  { %1411 = vmatpush1.bf16.msra.mxu0 %v4517_v14  ;;  %1454 = vmatpush1.bf16.msra.mxu1 %v4539_v20 }
 0x18e   :  { %1412 = vmatprep.subr.bf16.mxu0 %v4527_v17  ;;  %1455 = vmatprep.subr.bf16.mxu1 %v4545_v23 }
 0x191   :  { %1413 = vmatpush1.bf16.msra.mxu0 %v4535_v19  ;;  %1456 = vmatpush1.bf16.msra.mxu1 %v4551_v25 }
 0x192   :  { %1414 = vmatprep.subr.bf16.mxu0 %v4543_v21  ;;  %1457 = vmatprep.subr.bf16.mxu1 %v4559_v27 }
 0x195   :  { %1415 = vmatpush1.bf16.msra.mxu0 %v4548_v24  ;;  %1458 = vmatpush1.bf16.msra.mxu1 %v4567_v29 }
 0x196   :  { %1416 = vmatprep.subr.bf16.mxu0 %v4555_v26  ;;  %1459 = vmatprep.subr.bf16.mxu1 %v4573_v31 }
 0x199   :  { %1417 = vmatpush1.bf16.msra.mxu0 %v4564_v28  ;;  %1460 = vmatpush1.bf16.msra.mxu1 %v4579_v34 }
 0x19a   :  { %1418 = vmatprep.subr.bf16.mxu0 %v4571_v30  ;;  %1461 = vmatprep.subr.bf16.mxu1 %v4585_v36 }
 0x19d   :  { %1419 = vmatpush1.bf16.msra.mxu0 %v4575_v33  ;;  %1462 = vmatpush1.bf16.msra.mxu1 %v4591_v38 }
 0x19e   :  { %1420 = vmatprep.subr.bf16.mxu0 %v4583_v35  ;;  %1463 = vmatprep.subr.bf16.mxu1 %v4595_v39 }
 0x1a1   :  { %1421 = vmatpush1.bf16.msra.mxu0 %v4589_v37  ;;  %1464 = vmatpush1.bf16.msra.mxu1 %v4601_v41 }
 0x1a2   :  { %1812 = vmatprep.subr.bf16.mxu1 %v4510_v11 }
 0x257   :  { %v1077_v6 = vpop.f32.mrb[4].mxu0  ;;  %v1120_v8 = vpop.f32.mrb[4].mxu1 }
 0x258   :  { %v3813_v9 = vadd.f32 %v1077_v6, %v4662_v51  ;;  %v1079_v49 = vpop.f32.mrb[5].mxu0  ;;  %v1122_v53 = vpop.f32.mrb[5].mxu1  ;;  %v3845_v1 = vadd.f32 %v1120_v8, %v4669_v4 }
 0x259   :  { %v3814_v54 = vadd.f32 %v1079_v49, %v4664_v52  ;;  %v1081_v55 = vpop.f32.mrb[6].mxu0  ;;  %v1124_v56 = vpop.f32.mrb[6].mxu1  ;;  %v3846_v3 = vadd.f32 %v1122_v53, %v4672_v32 }
 0x25a   :  { %v3505_v57 = vmul.f32 -1.442695, %v3813_v9  ;;  %v3815_v58 = vadd.f32 %v1081_v55, %v4662_v51  ;;  %v1083_v59 = vpop.f32.mrb[7].mxu0  ;;  %v1126_v60 = vpop.f32.mrb[7].mxu1  ;;  %v3847_v2 = vadd.f32 %v1124_v56, %v4669_v4  ;;  %v3507_v5 = vmul.f32 -1.442695, %v3845_v1 }
 0x25b   :  { %v3506_v61 = vmul.f32 -1.442695, %v3814_v54  ;;  %v3816_v62 = vadd.f32 %v1083_v59, %v4664_v52  ;;  %v3848_v40 = vadd.f32 %v1126_v60, %v4672_v32 }
 0x25c   :  { %4095 = vpow2.f32 %v3505_v57  ;;  %v3508_v11 = vmul.f32 -1.442695, %v3815_v58  ;;  %v3510_v7 = vmul.f32 -1.442695, %v3847_v2 }
 0x25d   :  { %v3509_v63 = vmul.f32 -1.442695, %v3816_v62  ;;  %4097 = vpow2.f32 %v3506_v61 }
 0x25e   :  { %4099 = vpow2.f32 %v3508_v11 }
 0x25f   :  { %4101 = vpow2.f32 %v3509_v63 }
 0x260   :  { %4103 = vtanh.f32 %v3846_v3 }
 0x261   :  { %4105 = vpow2.f32 %v3507_v5 }
 0x262   :  { %4107 = vpow2.f32 %v3510_v7 }
 0x266   :  { %v4096_v22 = vpop.eup %4095 }
 0x267   :  { %v1164_v43 = vadd.f32 1.0, %v4096_v22  ;;  %v4098_v44 = vpop.eup %4097 }
 0x268   :  { %v4100_v45 = vpop.eup %4099  ;;  %v1165_v46 = vadd.f32 1.0, %v4098_v44 }
 0x269   :  { %4109 = vrcp.f32 %v1164_v43  ;;  %v1167_v47 = vadd.f32 1.0, %v4100_v45  ;;  %v4102_v48 = vpop.eup %4101 }
 0x26a   :  { %4111 = vtanh.f32 %v3848_v40  ;;  %v1168_v50 = vadd.f32 1.0, %v4102_v48  ;;  %v4104_v6 = vpop.eup %4103 }
 0x26b   :  { %4113 = vrcp.f32 %v1165_v46  ;;  %v4106_v8 = vpop.eup %4105 }
 0x26c   :  { %4115 = vrcp.f32 %v1167_v47  ;;  %v4108_v9 = vpop.eup %4107  ;;  %v1166_v57 = vadd.f32 1.0, %v4106_v8 }
 0x26d   :  { %4117 = vrcp.f32 %v1168_v50  ;;  %v1169_v62 = vadd.f32 1.0, %v4108_v9 }
 0x26e   :  { %4119 = vrcp.f32 %v1166_v57 }
 0x273   :  { %v4110_v49 = vpop.eup %4109 }
 0x274   :  { %v4112_v53 = vpop.eup %4111  ;;  %v1186_v54 = vmul.f32 %v4110_v49, %v4104_v6 }
 0x275   :  { %v4114_v55 = vpop.eup %4113 }
 0x276   :  { %v4116_v56 = vpop.eup %4115  ;;  %v1184_v58 = vmul.f32 %v4114_v55, %v4678_v12 }
 0x277   :  { %v1187_v59 = vmul.f32 %v4116_v56, %v4112_v53  ;;  %v4118_v60 = vpop.eup %4117 }
 0x278   :  { %v4726_v61 = vadd.f32 %v1186_v54, %v1184_v58  ;;  %v1185_v11 = vmul.f32 %v4118_v60, %v4681_v42  ;;  %v4120_v1 = vpop.eup %4119 }
 0x27a   :  { %4121 = vtanh.f32 %v4726_v61  ;;  %v4730_v63 = vadd.f32 %v1187_v59, %v1185_v11 }
 0x27b   :  { %4123 = vrcp.f32 %v1169_v62 }
 0x27c   :  { %4125 = vtanh.f32 %v4730_v63 }
 0x284   :  { %v4122_v2 = vpop.eup %4121 }
 0x285   :  { %v4124_v3 = vpop.eup %4123  ;;  %v1192_v12 = vmul.f32 %v4122_v2, %v4120_v1 }
 0x286   :  { %v4126_v5 = vpop.eup %4125 }
 0x287   :  { %v1193_v7 = vmul.f32 %v4126_v5, %v4124_v3 }
 0x289   :  { %v3777_v22 = vpack.c.bf16 %v1193_v7, %v1192_v12 }
 0x28b   :  { %3778 = vst [vmem:[#allocation11 + $0x8] sm:$0xff] %v3777_v22   ;;  %1439 = vmatmul.mubr.bf16.vlgmr.msra.gmra.mrb[8].mxu0 %v3777_v22  ;;  %1482 = vmatmul.mubr.bf16.vlgmr.msra.gmra.mrb[8].mxu1 %v3777_v22  ;;  %v4798_v22 = vld [vmem:[#allocation10 + $0x8] ss:$16 sps:$4 sm:$0xff]  }
 0x28c   :  { %1813 = vmatpush1.bf16.msra.mxu1 %v4508_v10  ;;  %1801 = vmatprep.mubr.bf16.mxu0 %v4420_v0  ;;  %v4750_v10 = vld [vmem:[#allocation10 + $0x4] ss:$16 sps:$4 sm:$0xff]  }
 0x28d   :  { %1814 = vmatprep.subr.bf16.mxu1 %v4521_v15  ;;  %1844 = vmatprep.mubr.bf16.mxu1 %v4420_v0  ;;  %v4752_v15 = vld [vmem:[#allocation10] ss:$16 sps:$4 sm:$0xff]  }
 0x28e   :  { %1769 = vmatprep.subr.bf16.mxu0 %v4750_v10 }
 0x28f   :  { %1770 = vmatpush1.bf16.msra.mxu0 %v4752_v15 }
 0x290   :  { %1815 = vmatpush1.bf16.msra.mxu1 %v4524_v16  ;;  %v4756_v16 = vld [vmem:[#allocation10 + $0x24] ss:$16 sps:$4 sm:$0xff]  }
 0x291   :  { %1816 = vmatprep.subr.bf16.mxu1 %v4531_v18  ;;  %v4758_v18 = vld [vmem:[#allocation10 + $0x20] ss:$16 sps:$4 sm:$0xff]   ;;  %1771 = vmatprep.subr.bf16.mxu0 %v4756_v16 }
 0x293   :  { %1772 = vmatpush1.bf16.msra.mxu0 %v4758_v18 }
 0x294   :  { %1817 = vmatpush1.bf16.msra.mxu1 %v4539_v20  ;;  %1773 = vmatprep.subr.bf16.mxu0 %v4515_v13 }
 0x295   :  { %1818 = vmatprep.subr.bf16.mxu1 %v4545_v23 }
 0x297   :  { %1774 = vmatpush1.bf16.msra.mxu0 %v4517_v14 }
 0x298   :  { %1819 = vmatpush1.bf16.msra.mxu1 %v4551_v25  ;;  %1775 = vmatprep.subr.bf16.mxu0 %v4527_v17 }
 0x299   :  { %1820 = vmatprep.subr.bf16.mxu1 %v4559_v27 }
 0x29b   :  { %1776 = vmatpush1.bf16.msra.mxu0 %v4535_v19 }
 0x29c   :  { %1821 = vmatpush1.bf16.msra.mxu1 %v4567_v29  ;;  %1777 = vmatprep.subr.bf16.mxu0 %v4543_v21 }
 0x29d   :  { %1822 = vmatprep.subr.bf16.mxu1 %v4573_v31 }
 0x29f   :  { %1778 = vmatpush1.bf16.msra.mxu0 %v4548_v24 }
 0x2a0   :  { %1823 = vmatpush1.bf16.msra.mxu1 %v4579_v34  ;;  %1779 = vmatprep.subr.bf16.mxu0 %v4555_v26 }
 0x2a1   :  { %1824 = vmatprep.subr.bf16.mxu1 %v4585_v36 }
 0x2a3   :  { %1780 = vmatpush1.bf16.msra.mxu0 %v4564_v28 }
 0x2a4   :  { %1825 = vmatpush1.bf16.msra.mxu1 %v4591_v38  ;;  %1781 = vmatprep.subr.bf16.mxu0 %v4571_v30 }
 0x2a5   :  { %1826 = vmatprep.subr.bf16.mxu1 %v4595_v39 }
 0x2a7   :  { %1782 = vmatpush1.bf16.msra.mxu0 %v4575_v33 }
 0x2a8   :  { %1827 = vmatpush1.bf16.msra.mxu1 %v4601_v41  ;;  %1783 = vmatprep.subr.bf16.mxu0 %v4583_v35 }
 0x2ab   :  { %1784 = vmatpush1.bf16.msra.mxu0 %v4589_v37 }
 0x2ac   :  { %2132 = vmatprep.subr.bf16.mxu0 %v4750_v10 }
 0x35e   :  { %v1440_v13 = vpop.f32.mrb[8].mxu0  ;;  %v1483_v14 = vpop.f32.mrb[8].mxu1 }
 0x35f   :  { %v3817_v17 = vadd.f32 %v1440_v13, %v4662_v51  ;;  %v1442_v19 = vpop.f32.mrb[9].mxu0  ;;  %v1485_v20 = vpop.f32.mrb[9].mxu1  ;;  %v3849_v34 = vadd.f32 %v1483_v14, %v4669_v4  ;;  %v4802_v13 = vld [vmem:[#allocation10 + $0x2c] ss:$16 sps:$4 sm:$0xff]   ;;  %v4804_v14 = vld [vmem:[#allocation10 + $0x28] ss:$16 sps:$4 sm:$0xff]  }
 0x360   :  { %v3818_v21 = vadd.f32 %v1442_v19, %v4664_v52  ;;  %v1444_v23 = vpop.f32.mrb[10].mxu0  ;;  %v1487_v24 = vpop.f32.mrb[10].mxu1  ;;  %v3850_v36 = vadd.f32 %v1485_v20, %v4672_v32  ;;  %v4810_v19 = vld [vmem:[#allocation10 + $0x4c] ss:$16 sps:$4 sm:$0xff]   ;;  %v4812_v20 = vld [vmem:[#allocation10 + $0x40] ss:$16 sps:$4 sm:$0xff]  }
 0x361   :  { %v3545_v25 = vmul.f32 -1.442695, %v3817_v17  ;;  %v3819_v26 = vadd.f32 %v1444_v23, %v4662_v51  ;;  %v1446_v27 = vpop.f32.mrb[11].mxu0  ;;  %v1489_v28 = vpop.f32.mrb[11].mxu1  ;;  %v3851_v35 = vadd.f32 %v1487_v24, %v4669_v4  ;;  %v3547_v37 = vmul.f32 -1.442695, %v3849_v34 }
 0x362   :  { %v3546_v29 = vmul.f32 -1.442695, %v3818_v21  ;;  %v3820_v30 = vadd.f32 %v1446_v27, %v4664_v52  ;;  %v3852_v41 = vadd.f32 %v1489_v28, %v4672_v32  ;;  %v4808_v17 = vld [vmem:[#allocation10 + $0x44] ss:$16 sps:$4 sm:$0xff]   ;;  %v4814_v21 = vld [vmem:[#allocation10 + $0x48] ss:$16 sps:$4 sm:$0xff]  }
 0x363   :  { %4127 = vpow2.f32 %v3545_v25  ;;  %v3548_v31 = vmul.f32 -1.442695, %v3819_v26  ;;  %v3550_v38 = vmul.f32 -1.442695, %v3851_v35  ;;  %v4820_v23 = vld [vmem:[#allocation10 + $0x64] ss:$16 sps:$4 sm:$0xff]  }
 0x364   :  { %v3549_v33 = vmul.f32 -1.442695, %v3820_v30  ;;  %4129 = vpow2.f32 %v3546_v29  ;;  %v4822_v24 = vld [vmem:[#allocation10 + $0x6c] ss:$16 sps:$4 sm:$0xff]   ;;  %v4824_v25 = vld [vmem:[#allocation10 + $0x60] ss:$16 sps:$4 sm:$0xff]  }
 0x365   :  { %4131 = vpow2.f32 %v3548_v31  ;;  %v4826_v26 = vld [vmem:[#allocation10 + $0x68] ss:$16 sps:$4 sm:$0xff]   ;;  %v4832_v27 = vld [vmem:[#allocation10 + $0x80] ss:$16 sps:$4 sm:$0xff]   ;;  %v4834_v28 = vld [vmem:[#allocation10 + $0x84] ss:$16 sps:$4 sm:$0xff]  }
 0x366   :  { %4133 = vpow2.f32 %v3549_v33  ;;  %v4836_v29 = vld [vmem:[#allocation10 + $0x88] ss:$16 sps:$4 sm:$0xff]   ;;  %v4838_v30 = vld [vmem:[#allocation10 + $0x8c] ss:$16 sps:$4 sm:$0xff]   ;;  %v4840_v31 = vld [vmem:[#allocation10 + $0xa4] ss:$16 sps:$4 sm:$0xff]  }
 0x367   :  { %4135 = vtanh.f32 %v3850_v36  ;;  %v4843_v33 = vld [vmem:[#allocation10 + $0xac] ss:$16 sps:$4 sm:$0xff]   ;;  %v4847_v34 = vld [vmem:[#allocation10 + $0xa0] ss:$16 sps:$4 sm:$0xff]   ;;  %v4851_v35 = vld [vmem:[#allocation10 + $0xa8] ss:$16 sps:$4 sm:$0xff]  }
 0x368   :  { %4137 = vpow2.f32 %v3547_v37  ;;  %v4853_v36 = vld [vmem:[#allocation10 + $0xc4] ss:$16 sps:$4 sm:$0xff]   ;;  %v4856_v37 = vld [vmem:[#allocation10 + $0xcc] ss:$16 sps:$4 sm:$0xff]  }
 0x369   :  { %4139 = vpow2.f32 %v3550_v38  ;;  %v4859_v38 = vld [vmem:[#allocation10 + $0xc0] ss:$16 sps:$4 sm:$0xff]  }
 0x36d   :  { %v4128_v39 = vpop.eup %4127 }
 0x36e   :  { %v1527_v42 = vadd.f32 1.0, %v4128_v39  ;;  %v4130_v40 = vpop.eup %4129  ;;  %v4863_v39 = vld [vmem:[#allocation10 + $0xc8] ss:$16 sps:$4 sm:$0xff]  }
 0x36f   :  { %v4132_v43 = vpop.eup %4131  ;;  %v1528_v44 = vadd.f32 1.0, %v4130_v40  ;;  %v4871_v40 = vld [vmem:[#allocation10 + $0xe0] ss:$16 sps:$4 sm:$0xff]  }
 0x370   :  { %4141 = vrcp.f32 %v1527_v42  ;;  %v1530_v45 = vadd.f32 1.0, %v4132_v43  ;;  %v4134_v46 = vpop.eup %4133  ;;  %v4868_v42 = vld [vmem:[#allocation10 + $0xec] ss:$16 sps:$4 sm:$0xff]   ;;  %v4875_v43 = vld [vmem:[#allocation10 + $0xe8] ss:$16 sps:$4 sm:$0xff]  }
 0x371   :  { %4143 = vtanh.f32 %v3852_v41  ;;  %v1531_v47 = vadd.f32 1.0, %v4134_v46  ;;  %v4136_v48 = vpop.eup %4135  ;;  %v4865_v41 = vld [vmem:[#allocation10 + $0xe4] ss:$16 sps:$4 sm:$0xff]  }
 0x372   :  { %4145 = vrcp.f32 %v1528_v44  ;;  %v4138_v50 = vpop.eup %4137 }
 0x373   :  { %4147 = vrcp.f32 %v1530_v45  ;;  %v4140_v6 = vpop.eup %4139  ;;  %v1529_v55 = vadd.f32 1.0, %v4138_v50 }
 0x374   :  { %4149 = vrcp.f32 %v1531_v47  ;;  %v1532_v60 = vadd.f32 1.0, %v4140_v6 }
 0x375   :  { %4151 = vrcp.f32 %v1529_v55 }
 0x37a   :  { %v4142_v8 = vpop.eup %4141 }
 0x37b   :  { %v4144_v9 = vpop.eup %4143  ;;  %v1549_v49 = vmul.f32 %v4142_v8, %v4136_v48 }
 0x37c   :  { %v4146_v53 = vpop.eup %4145 }
 0x37d   :  { %v4148_v54 = vpop.eup %4147  ;;  %v1547_v56 = vmul.f32 %v4146_v53, %v4726_v61 }
 0x37e   :  { %v1550_v57 = vmul.f32 %v4148_v54, %v4144_v9  ;;  %v4150_v58 = vpop.eup %4149 }
 0x37f   :  { %v4784_v59 = vadd.f32 %v1549_v49, %v1547_v56  ;;  %v1548_v62 = vmul.f32 %v4150_v58, %v4730_v63  ;;  %v4152_v1 = vpop.eup %4151  ;;  %v4796_v63 = vld [vmem:[#allocation10 + $0xc] ss:$16 sps:$4 sm:$0xff]  }
 0x380   :  { %2175 = vmatprep.subr.bf16.mxu1 %v4796_v63 }
 0x381   :  { %4153 = vtanh.f32 %v4784_v59  ;;  %v4788_v11 = vadd.f32 %v1550_v57, %v1548_v62 }
 0x382   :  { %4155 = vrcp.f32 %v1532_v60 }
 0x383   :  { %4157 = vtanh.f32 %v4788_v11 }
 0x38b   :  { %v4154_v2 = vpop.eup %4153 }
 0x38c   :  { %v4156_v3 = vpop.eup %4155  ;;  %v1555_v61 = vmul.f32 %v4154_v2, %v4152_v1 }
 0x38d   :  { %v4158_v5 = vpop.eup %4157 }
 0x38e   :  { %v1556_v12 = vmul.f32 %v4158_v5, %v4156_v3 }
 0x390   :  { %v3782_v7 = vpack.c.bf16 %v1556_v12, %v1555_v61 }
 0x392   :  { %3783 = vst [vmem:[#allocation11 + $0x10] sm:$0xff] %v3782_v7   ;;  %1802 = vmatmul.mubr.bf16.vlgmr.msra.gmra.mrb[12].mxu0 %v3782_v7  ;;  %1845 = vmatmul.mubr.bf16.vlgmr.msra.gmra.mrb[12].mxu1 %v3782_v7 }
 0x393   :  { %2133 = vmatpush1.bf16.msra.mxu0 %v4752_v15  ;;  %2164 = vmatprep.mubr.bf16.mxu0 %v4420_v0 }
 0x394   :  { %2134 = vmatprep.subr.bf16.mxu0 %v4756_v16  ;;  %2207 = vmatprep.mubr.bf16.mxu1 %v4420_v0 }
 0x395   :  { %2176 = vmatpush1.bf16.msra.mxu1 %v4798_v22 }
 0x396   :  { %2177 = vmatprep.subr.bf16.mxu1 %v4802_v13 }
 0x397   :  { %2135 = vmatpush1.bf16.msra.mxu0 %v4758_v18 }
 0x398   :  { %2136 = vmatprep.subr.bf16.mxu0 %v4808_v17 }
 0x399   :  { %2178 = vmatpush1.bf16.msra.mxu1 %v4804_v14 }
 0x39a   :  { %2179 = vmatprep.subr.bf16.mxu1 %v4810_v19 }
 0x39b   :  { %2137 = vmatpush1.bf16.msra.mxu0 %v4812_v20 }
 0x39c   :  { %2138 = vmatprep.subr.bf16.mxu0 %v4820_v23 }
 0x39d   :  { %2180 = vmatpush1.bf16.msra.mxu1 %v4814_v21 }
 0x39e   :  { %2181 = vmatprep.subr.bf16.mxu1 %v4822_v24 }
 0x39f   :  { %2139 = vmatpush1.bf16.msra.mxu0 %v4824_v25 }
 0x3a0   :  { %2140 = vmatprep.subr.bf16.mxu0 %v4834_v28 }
 0x3a1   :  { %2182 = vmatpush1.bf16.msra.mxu1 %v4826_v26 }
 0x3a2   :  { %2183 = vmatprep.subr.bf16.mxu1 %v4838_v30 }
 0x3a3   :  { %2141 = vmatpush1.bf16.msra.mxu0 %v4832_v27 }
 0x3a4   :  { %2142 = vmatprep.subr.bf16.mxu0 %v4840_v31 }
 0x3a5   :  { %2184 = vmatpush1.bf16.msra.mxu1 %v4836_v29 }
 0x3a6   :  { %2185 = vmatprep.subr.bf16.mxu1 %v4843_v33 }
 0x3a7   :  { %2143 = vmatpush1.bf16.msra.mxu0 %v4847_v34 }
 0x3a8   :  { %2144 = vmatprep.subr.bf16.mxu0 %v4853_v36 }
 0x3a9   :  { %2186 = vmatpush1.bf16.msra.mxu1 %v4851_v35 }
 0x3aa   :  { %2187 = vmatprep.subr.bf16.mxu1 %v4856_v37 }
 0x3ab   :  { %2145 = vmatpush1.bf16.msra.mxu0 %v4859_v38 }
 0x3ac   :  { %2146 = vmatprep.subr.bf16.mxu0 %v4865_v41 }
 0x3ad   :  { %2188 = vmatpush1.bf16.msra.mxu1 %v4863_v39 }
 0x3ae   :  { %2189 = vmatprep.subr.bf16.mxu1 %v4868_v42 }
 0x3af   :  { %2147 = vmatpush1.bf16.msra.mxu0 %v4871_v40 }
 0x3b0   :  { %2495 = vmatprep.subr.bf16.mxu0 %v4750_v10 }
 0x3b1   :  { %2190 = vmatpush1.bf16.msra.mxu1 %v4875_v43 }
 0x3b2   :  { %2538 = vmatprep.subr.bf16.mxu1 %v4796_v63 }
 0x465   :  { %v1803_v44 = vpop.f32.mrb[12].mxu0  ;;  %v1846_v45 = vpop.f32.mrb[12].mxu1 }
 0x466   :  { %v3821_v46 = vadd.f32 %v1803_v44, %v4662_v51  ;;  %v1805_v47 = vpop.f32.mrb[13].mxu0  ;;  %v1848_v48 = vpop.f32.mrb[13].mxu1  ;;  %v3853_v60 = vadd.f32 %v1846_v45, %v4669_v4 }
 0x467   :  { %v3822_v50 = vadd.f32 %v1805_v47, %v4664_v52  ;;  %v1807_v6 = vpop.f32.mrb[14].mxu0  ;;  %v1850_v8 = vpop.f32.mrb[14].mxu1  ;;  %v3854_v1 = vadd.f32 %v1848_v48, %v4672_v32 }
 0x468   :  { %v3585_v9 = vmul.f32 -1.442695, %v3821_v46  ;;  %v3823_v49 = vadd.f32 %v1807_v6, %v4662_v51  ;;  %v1809_v53 = vpop.f32.mrb[15].mxu0  ;;  %v1852_v54 = vpop.f32.mrb[15].mxu1  ;;  %v3855_v62 = vadd.f32 %v1850_v8, %v4669_v4  ;;  %v3587_v2 = vmul.f32 -1.442695, %v3853_v60 }
 0x469   :  { %v3586_v55 = vmul.f32 -1.442695, %v3822_v50  ;;  %v3824_v56 = vadd.f32 %v1809_v53, %v4664_v52  ;;  %v3856_v61 = vadd.f32 %v1852_v54, %v4672_v32 }
 0x46a   :  { %4159 = vpow2.f32 %v3585_v9  ;;  %v3588_v57 = vmul.f32 -1.442695, %v3823_v49  ;;  %v3590_v3 = vmul.f32 -1.442695, %v3855_v62 }
 0x46b   :  { %v3589_v58 = vmul.f32 -1.442695, %v3824_v56  ;;  %4161 = vpow2.f32 %v3586_v55 }
 0x46c   :  { %4163 = vpow2.f32 %v3588_v57 }
 0x46d   :  { %4165 = vpow2.f32 %v3589_v58 }
 0x46e   :  { %4167 = vtanh.f32 %v3854_v1 }
 0x46f   :  { %4169 = vpow2.f32 %v3587_v2 }
 0x470   :  { %4171 = vpow2.f32 %v3590_v3 }
 0x474   :  { %v4160_v5 = vpop.eup %4159 }
 0x475   :  { %v1890_v12 = vadd.f32 1.0, %v4160_v5  ;;  %v4162_v7 = vpop.eup %4161 }
 0x476   :  { %v4164_v44 = vpop.eup %4163  ;;  %v1891_v46 = vadd.f32 1.0, %v4162_v7 }
 0x477   :  { %4173 = vrcp.f32 %v1890_v12  ;;  %v1893_v45 = vadd.f32 1.0, %v4164_v44  ;;  %v4166_v47 = vpop.eup %4165 }
 0x478   :  { %4175 = vtanh.f32 %v3856_v61  ;;  %v1894_v50 = vadd.f32 1.0, %v4166_v47  ;;  %v4168_v48 = vpop.eup %4167 }
 0x479   :  { %4177 = vrcp.f32 %v1891_v46  ;;  %v4170_v6 = vpop.eup %4169 }
 0x47a   :  { %4179 = vrcp.f32 %v1893_v45  ;;  %v4172_v8 = vpop.eup %4171  ;;  %v1892_v56 = vadd.f32 1.0, %v4170_v6 }
 0x47b   :  { %4181 = vrcp.f32 %v1894_v50  ;;  %v1895_v1 = vadd.f32 1.0, %v4172_v8 }
 0x47c   :  { %4183 = vrcp.f32 %v1892_v56 }
 0x481   :  { %v4174_v9 = vpop.eup %4173 }
 0x482   :  { %v4176_v49 = vpop.eup %4175  ;;  %v1912_v53 = vmul.f32 %v4174_v9, %v4168_v48 }
 0x483   :  { %v4178_v54 = vpop.eup %4177 }
 0x484   :  { %v4180_v55 = vpop.eup %4179  ;;  %v1910_v57 = vmul.f32 %v4178_v54, %v4784_v59 }
 0x485   :  { %v1913_v58 = vmul.f32 %v4180_v55, %v4176_v49  ;;  %v4182_v60 = vpop.eup %4181 }
 0x486   :  { %v4891_v62 = vadd.f32 %v1912_v53, %v1910_v57  ;;  %v1911_v2 = vmul.f32 %v4182_v60, %v4788_v11  ;;  %v4184_v5 = vpop.eup %4183 }
 0x488   :  { %4185 = vtanh.f32 %v4891_v62  ;;  %v4895_v3 = vadd.f32 %v1913_v58, %v1911_v2 }
 0x489   :  { %4187 = vrcp.f32 %v1895_v1 }
 0x48a   :  { %4189 = vtanh.f32 %v4895_v3 }
 0x492   :  { %v4186_v61 = vpop.eup %4185 }
 0x493   :  { %v4188_v12 = vpop.eup %4187  ;;  %v1918_v59 = vmul.f32 %v4186_v61, %v4184_v5 }
 0x494   :  { %v4190_v7 = vpop.eup %4189 }
 0x495   :  { %v1919_v44 = vmul.f32 %v4190_v7, %v4188_v12 }
 0x497   :  { %v3787_v46 = vpack.c.bf16 %v1919_v44, %v1918_v59 }
 0x499   :  { %3788 = vst [vmem:[#allocation11 + $0x18] sm:$0xff] %v3787_v46   ;;  %2165 = vmatmul.mubr.bf16.vlgmr.msra.gmra.mrb[16].mxu0 %v3787_v46  ;;  %2208 = vmatmul.mubr.bf16.vlgmr.msra.gmra.mrb[16].mxu1 %v3787_v46 }
 0x49a   :  { %2496 = vmatpush1.bf16.msra.mxu0 %v4752_v15  ;;  %2539 = vmatpush1.bf16.msra.mxu1 %v4798_v22 }
 0x49b   :  { %2497 = vmatprep.subr.bf16.mxu0 %v4756_v16  ;;  %2540 = vmatprep.subr.bf16.mxu1 %v4802_v13 }
 0x49c   :  { %2527 = vmatprep.mubr.bf16.mxu0 %v4420_v0  ;;  %2570 = vmatprep.mubr.bf16.mxu1 %v4420_v0 }
 0x49e   :  { %2498 = vmatpush1.bf16.msra.mxu0 %v4758_v18  ;;  %2541 = vmatpush1.bf16.msra.mxu1 %v4804_v14 }
 0x49f   :  { %2499 = vmatprep.subr.bf16.mxu0 %v4808_v17  ;;  %2542 = vmatprep.subr.bf16.mxu1 %v4810_v19 }
 0x4a2   :  { %2500 = vmatpush1.bf16.msra.mxu0 %v4812_v20  ;;  %2543 = vmatpush1.bf16.msra.mxu1 %v4814_v21 }
 0x4a3   :  { %2501 = vmatprep.subr.bf16.mxu0 %v4820_v23  ;;  %2544 = vmatprep.subr.bf16.mxu1 %v4822_v24 }
 0x4a6   :  { %2502 = vmatpush1.bf16.msra.mxu0 %v4824_v25  ;;  %2545 = vmatpush1.bf16.msra.mxu1 %v4826_v26 }
 0x4a7   :  { %2503 = vmatprep.subr.bf16.mxu0 %v4834_v28  ;;  %2546 = vmatprep.subr.bf16.mxu1 %v4838_v30 }
 0x4aa   :  { %2504 = vmatpush1.bf16.msra.mxu0 %v4832_v27  ;;  %2547 = vmatpush1.bf16.msra.mxu1 %v4836_v29 }
 0x4ab   :  { %2505 = vmatprep.subr.bf16.mxu0 %v4840_v31  ;;  %2548 = vmatprep.subr.bf16.mxu1 %v4843_v33 }
 0x4ae   :  { %2506 = vmatpush1.bf16.msra.mxu0 %v4847_v34  ;;  %2549 = vmatpush1.bf16.msra.mxu1 %v4851_v35 }
 0x4af   :  { %2507 = vmatprep.subr.bf16.mxu0 %v4853_v36  ;;  %2550 = vmatprep.subr.bf16.mxu1 %v4856_v37 }
 0x4b2   :  { %2508 = vmatpush1.bf16.msra.mxu0 %v4859_v38  ;;  %2551 = vmatpush1.bf16.msra.mxu1 %v4863_v39 }
 0x4b3   :  { %2509 = vmatprep.subr.bf16.mxu0 %v4865_v41  ;;  %2552 = vmatprep.subr.bf16.mxu1 %v4868_v42 }
 0x4b6   :  { %2510 = vmatpush1.bf16.msra.mxu0 %v4871_v40  ;;  %2553 = vmatpush1.bf16.msra.mxu1 %v4875_v43 }
 0x4b7   :  { %2858 = vmatprep.subr.bf16.mxu0 %v4750_v10  ;;  %2901 = vmatprep.subr.bf16.mxu1 %v4796_v63 }
 0x56c   :  { %v2166_v11 = vpop.f32.mrb[16].mxu0  ;;  %v2209_v45 = vpop.f32.mrb[16].mxu1 }
 0x56d   :  { %v3825_v47 = vadd.f32 %v2166_v11, %v4662_v51  ;;  %v2168_v50 = vpop.f32.mrb[17].mxu0  ;;  %v2211_v48 = vpop.f32.mrb[17].mxu1  ;;  %v3857_v60 = vadd.f32 %v2209_v45, %v4669_v4 }
 0x56e   :  { %v3826_v6 = vadd.f32 %v2168_v50, %v4664_v52  ;;  %v2170_v8 = vpop.f32.mrb[18].mxu0  ;;  %v2213_v9 = vpop.f32.mrb[18].mxu1  ;;  %v3858_v2 = vadd.f32 %v2211_v48, %v4672_v32 }
 0x56f   :  { %v3625_v49 = vmul.f32 -1.442695, %v3825_v47  ;;  %v3827_v53 = vadd.f32 %v2170_v8, %v4662_v51  ;;  %v2172_v54 = vpop.f32.mrb[19].mxu0  ;;  %v2215_v55 = vpop.f32.mrb[19].mxu1  ;;  %v3859_v1 = vadd.f32 %v2213_v9, %v4669_v4  ;;  %v3627_v5 = vmul.f32 -1.442695, %v3857_v60 }
 0x570   :  { %v3626_v56 = vmul.f32 -1.442695, %v3826_v6  ;;  %v3828_v10 = vadd.f32 %v2172_v54, %v4664_v52  ;;  %v3860_v7 = vadd.f32 %v2215_v55, %v4672_v32 }
 0x571   :  { %4191 = vpow2.f32 %v3625_v49  ;;  %v3628_v57 = vmul.f32 -1.442695, %v3827_v53  ;;  %v3630_v61 = vmul.f32 -1.442695, %v3859_v1 }
 0x572   :  { %v3629_v58 = vmul.f32 -1.442695, %v3828_v10  ;;  %4193 = vpow2.f32 %v3626_v56 }
 0x573   :  { %4195 = vpow2.f32 %v3628_v57 }
 0x574   :  { %4197 = vpow2.f32 %v3629_v58 }
 0x575   :  { %4199 = vtanh.f32 %v3858_v2 }
 0x576   :  { %4201 = vpow2.f32 %v3627_v5 }
 0x577   :  { %4203 = vpow2.f32 %v3630_v61 }
 0x57b   :  { %v4192_v12 = vpop.eup %4191 }
 0x57c   :  { %v2253_v59 = vadd.f32 1.0, %v4192_v12  ;;  %v4194_v44 = vpop.eup %4193 }
 0x57d   :  { %v4196_v46 = vpop.eup %4195  ;;  %v2254_v11 = vadd.f32 1.0, %v4194_v44 }
 0x57e   :  { %4205 = vrcp.f32 %v2253_v59  ;;  %v2256_v45 = vadd.f32 1.0, %v4196_v46  ;;  %v4198_v47 = vpop.eup %4197 }
 0x57f   :  { %4207 = vtanh.f32 %v3860_v7  ;;  %v2257_v50 = vadd.f32 1.0, %v4198_v47  ;;  %v4200_v48 = vpop.eup %4199 }
 0x580   :  { %4209 = vrcp.f32 %v2254_v11  ;;  %v4202_v6 = vpop.eup %4201 }
 0x581   :  { %4211 = vrcp.f32 %v2256_v45  ;;  %v4204_v8 = vpop.eup %4203  ;;  %v2255_v56 = vadd.f32 1.0, %v4202_v6 }
 0x582   :  { %4213 = vrcp.f32 %v2257_v50  ;;  %v2258_v1 = vadd.f32 1.0, %v4204_v8 }
 0x583   :  { %4215 = vrcp.f32 %v2255_v56 }
 0x588   :  { %v4206_v9 = vpop.eup %4205 }
 0x589   :  { %v4208_v49 = vpop.eup %4207  ;;  %v2275_v53 = vmul.f32 %v4206_v9, %v4200_v48 }
 0x58a   :  { %v4210_v54 = vpop.eup %4209 }
 0x58b   :  { %v4212_v55 = vpop.eup %4211  ;;  %v2273_v10 = vmul.f32 %v4210_v54, %v4891_v62 }
 0x58c   :  { %v2276_v57 = vmul.f32 %v4212_v55, %v4208_v49  ;;  %v4214_v58 = vpop.eup %4213 }
 0x58d   :  { %v4941_v60 = vadd.f32 %v2275_v53, %v2273_v10  ;;  %v2274_v2 = vmul.f32 %v4214_v58, %v4895_v3  ;;  %v4216_v61 = vpop.eup %4215 }
 0x58f   :  { %4217 = vtanh.f32 %v4941_v60  ;;  %v4945_v5 = vadd.f32 %v2276_v57, %v2274_v2 }
 0x590   :  { %4219 = vrcp.f32 %v2258_v1 }
 0x591   :  { %4221 = vtanh.f32 %v4945_v5 }
 0x599   :  { %v4218_v12 = vpop.eup %4217 }
 0x59a   :  { %v4220_v7 = vpop.eup %4219  ;;  %v2281_v62 = vmul.f32 %v4218_v12, %v4216_v61 }
 0x59b   :  { %v4222_v59 = vpop.eup %4221 }
 0x59c   :  { %v2282_v44 = vmul.f32 %v4222_v59, %v4220_v7 }
 0x59e   :  { %v3792_v46 = vpack.c.bf16 %v2282_v44, %v2281_v62 }
 0x5a0   :  { %3793 = vst [vmem:[#allocation11 + $0x20] sm:$0xff] %v3792_v46   ;;  %2528 = vmatmul.mubr.bf16.vlgmr.msra.gmra.mrb[20].mxu0 %v3792_v46  ;;  %2571 = vmatmul.mubr.bf16.vlgmr.msra.gmra.mrb[20].mxu1 %v3792_v46 }
 0x5a1   :  { %2859 = vmatpush1.bf16.msra.mxu0 %v4752_v15  ;;  %2902 = vmatpush1.bf16.msra.mxu1 %v4798_v22 }
 0x5a2   :  { %2860 = vmatprep.subr.bf16.mxu0 %v4756_v16  ;;  %2903 = vmatprep.subr.bf16.mxu1 %v4802_v13 }
 0x5a3   :  { %2890 = vmatprep.mubr.bf16.mxu0 %v4420_v0  ;;  %2933 = vmatprep.mubr.bf16.mxu1 %v4420_v0 }
 0x5a5   :  { %2861 = vmatpush1.bf16.msra.mxu0 %v4758_v18  ;;  %2904 = vmatpush1.bf16.msra.mxu1 %v4804_v14 }
 0x5a6   :  { %2862 = vmatprep.subr.bf16.mxu0 %v4808_v17  ;;  %2905 = vmatprep.subr.bf16.mxu1 %v4810_v19 }
 0x5a9   :  { %2863 = vmatpush1.bf16.msra.mxu0 %v4812_v20  ;;  %2906 = vmatpush1.bf16.msra.mxu1 %v4814_v21 }
 0x5aa   :  { %2864 = vmatprep.subr.bf16.mxu0 %v4820_v23  ;;  %2907 = vmatprep.subr.bf16.mxu1 %v4822_v24 }
 0x5ad   :  { %2865 = vmatpush1.bf16.msra.mxu0 %v4824_v25  ;;  %2908 = vmatpush1.bf16.msra.mxu1 %v4826_v26 }
 0x5ae   :  { %2866 = vmatprep.subr.bf16.mxu0 %v4834_v28  ;;  %2909 = vmatprep.subr.bf16.mxu1 %v4838_v30 }
 0x5b1   :  { %2867 = vmatpush1.bf16.msra.mxu0 %v4832_v27  ;;  %2910 = vmatpush1.bf16.msra.mxu1 %v4836_v29 }
 0x5b2   :  { %2868 = vmatprep.subr.bf16.mxu0 %v4840_v31  ;;  %2911 = vmatprep.subr.bf16.mxu1 %v4843_v33 }
 0x5b5   :  { %2869 = vmatpush1.bf16.msra.mxu0 %v4847_v34  ;;  %2912 = vmatpush1.bf16.msra.mxu1 %v4851_v35 }
 0x5b6   :  { %2870 = vmatprep.subr.bf16.mxu0 %v4853_v36  ;;  %2913 = vmatprep.subr.bf16.mxu1 %v4856_v37 }
 0x5b9   :  { %2871 = vmatpush1.bf16.msra.mxu0 %v4859_v38  ;;  %2914 = vmatpush1.bf16.msra.mxu1 %v4863_v39 }
 0x5ba   :  { %2872 = vmatprep.subr.bf16.mxu0 %v4865_v41  ;;  %2915 = vmatprep.subr.bf16.mxu1 %v4868_v42 }
 0x5bd   :  { %2873 = vmatpush1.bf16.msra.mxu0 %v4871_v40  ;;  %2916 = vmatpush1.bf16.msra.mxu1 %v4875_v43 }
 0x5be   :  { %3264 = vmatprep.subr.bf16.mxu1 %v4796_v63 }
 0x673   :  { %v2529_v15 = vpop.f32.mrb[20].mxu0  ;;  %v2572_v16 = vpop.f32.mrb[20].mxu1 }
 0x674   :  { %v3829_v18 = vadd.f32 %v2529_v15, %v4662_v51  ;;  %v2531_v3 = vpop.f32.mrb[21].mxu0  ;;  %v2574_v11 = vpop.f32.mrb[21].mxu1  ;;  %v3861_v55 = vadd.f32 %v2572_v16, %v4669_v4 }
 0x675   :  { %v3830_v45 = vadd.f32 %v2531_v3, %v4664_v52  ;;  %v2533_v47 = vpop.f32.mrb[22].mxu0  ;;  %v2576_v50 = vpop.f32.mrb[22].mxu1  ;;  %v3862_v10 = vadd.f32 %v2574_v11, %v4672_v32 }
 0x676   :  { %v3665_v48 = vmul.f32 -1.442695, %v3829_v18  ;;  %v3831_v6 = vadd.f32 %v2533_v47, %v4662_v51  ;;  %v2535_v8 = vpop.f32.mrb[23].mxu0  ;;  %v2578_v9 = vpop.f32.mrb[23].mxu1  ;;  %v3863_v56 = vadd.f32 %v2576_v50, %v4669_v4  ;;  %v3667_v57 = vmul.f32 -1.442695, %v3861_v55 }
 0x677   :  { %v3666_v49 = vmul.f32 -1.442695, %v3830_v45  ;;  %v3832_v53 = vadd.f32 %v2535_v8, %v4664_v52  ;;  %v3864_v2 = vadd.f32 %v2578_v9, %v4672_v32 }
 0x678   :  { %4223 = vpow2.f32 %v3665_v48  ;;  %v3668_v63 = vmul.f32 -1.442695, %v3831_v6  ;;  %v3670_v58 = vmul.f32 -1.442695, %v3863_v56 }
 0x679   :  { %v3669_v54 = vmul.f32 -1.442695, %v3832_v53  ;;  %4225 = vpow2.f32 %v3666_v49 }
 0x67a   :  { %4227 = vpow2.f32 %v3668_v63 }
 0x67b   :  { %4229 = vpow2.f32 %v3669_v54 }
 0x67c   :  { %4231 = vtanh.f32 %v3862_v10 }
 0x67d   :  { %4233 = vpow2.f32 %v3667_v57 }
 0x67e   :  { %4235 = vpow2.f32 %v3670_v58 }
 0x682   :  { %v4224_v1 = vpop.eup %4223 }
 0x683   :  { %v2616_v61 = vadd.f32 1.0, %v4224_v1  ;;  %v4226_v12 = vpop.eup %4225 }
 0x684   :  { %v4228_v7 = vpop.eup %4227  ;;  %v2617_v59 = vadd.f32 1.0, %v4226_v12 }
 0x685   :  { %4237 = vrcp.f32 %v2616_v61  ;;  %v2619_v62 = vadd.f32 1.0, %v4228_v7  ;;  %v4230_v44 = vpop.eup %4229 }
 0x686   :  { %4239 = vtanh.f32 %v3864_v2  ;;  %v2620_v46 = vadd.f32 1.0, %v4230_v44  ;;  %v4232_v15 = vpop.eup %4231 }
 0x687   :  { %4241 = vrcp.f32 %v2617_v59  ;;  %v4234_v16 = vpop.eup %4233 }
 0x688   :  { %4243 = vrcp.f32 %v2619_v62  ;;  %v4236_v18 = vpop.eup %4235  ;;  %v2618_v48 = vadd.f32 1.0, %v4234_v16 }
 0x689   :  { %4245 = vrcp.f32 %v2620_v46  ;;  %v2621_v53 = vadd.f32 1.0, %v4236_v18 }
 0x68a   :  { %4247 = vrcp.f32 %v2618_v48 }
 0x68f   :  { %v4238_v3 = vpop.eup %4237 }
 0x690   :  { %v4240_v11 = vpop.eup %4239  ;;  %v2638_v45 = vmul.f32 %v4238_v3, %v4232_v15 }
 0x691   :  { %v4242_v47 = vpop.eup %4241 }
 0x692   :  { %v4244_v50 = vpop.eup %4243  ;;  %v2636_v6 = vmul.f32 %v4242_v47, %v4941_v60 }
 0x693   :  { %v2639_v8 = vmul.f32 %v4244_v50, %v4240_v11  ;;  %v4246_v9 = vpop.eup %4245 }
 0x694   :  { %v4990_v49 = vadd.f32 %v2638_v45, %v2636_v6  ;;  %v2637_v63 = vmul.f32 %v4246_v9, %v4945_v5  ;;  %v4248_v55 = vpop.eup %4247 }
 0x696   :  { %4249 = vtanh.f32 %v4990_v49  ;;  %v4994_v54 = vadd.f32 %v2639_v8, %v2637_v63 }
 0x697   :  { %4251 = vrcp.f32 %v2621_v53 }
 0x698   :  { %4253 = vtanh.f32 %v4994_v54 }
 0x6a0   :  { %v4250_v56 = vpop.eup %4249 }
 0x6a1   :  { %v4252_v10 = vpop.eup %4251  ;;  %v2644_v60 = vmul.f32 %v4250_v56, %v4248_v55 }
 0x6a2   :  { %v4254_v57 = vpop.eup %4253 }
 0x6a3   :  { %v2645_v58 = vmul.f32 %v4254_v57, %v4252_v10 }
 0x6a5   :  { %v3797_v1 = vpack.c.bf16 %v2645_v58, %v2644_v60 }
 0x6a7   :  { %3798 = vst [vmem:[#allocation11 + $0x28] sm:$0xff] %v3797_v1   ;;  %2891 = vmatmul.mubr.bf16.vlgmr.msra.gmra.mrb[24].mxu0 %v3797_v1  ;;  %2934 = vmatmul.mubr.bf16.vlgmr.msra.gmra.mrb[24].mxu1 %v3797_v1 }
 0x6a8   :  { %3265 = vmatpush1.bf16.msra.mxu1 %v4798_v22  ;;  %3253 = vmatprep.mubr.bf16.mxu0 %v4420_v0  ;;  %v4057_v22 = vld [vmem:[#allocation10] ss:$16 sps:$4 sm:$0xff]  }
 0x6a9   :  { %3266 = vmatprep.subr.bf16.mxu1 %v4802_v13  ;;  %3296 = vmatprep.mubr.bf16.mxu1 %v4420_v0  ;;  %v4059_v0 = vld [vmem:[#allocation10 + $0x4] ss:$16 sps:$4 sm:$0xff]  }
 0x6aa   :  { %3221 = vmatprep.subr.bf16.mxu0 %v4059_v0  ;;  %v4062_v13 = vld [vmem:[#allocation10 + $0x24] ss:$16 sps:$4 sm:$0xff]  }
 0x6ab   :  { %3222 = vmatpush1.bf16.msra.mxu0 %v4057_v22 }
 0x6ac   :  { %3267 = vmatpush1.bf16.msra.mxu1 %v4804_v14  ;;  %v4060_v14 = vld [vmem:[#allocation10 + $0x20] ss:$16 sps:$4 sm:$0xff]   ;;  %3223 = vmatprep.subr.bf16.mxu0 %v4062_v13 }
 0x6ad   :  { %3268 = vmatprep.subr.bf16.mxu1 %v4810_v19 }
 0x6af   :  { %3224 = vmatpush1.bf16.msra.mxu0 %v4060_v14 }
 0x6b0   :  { %3269 = vmatpush1.bf16.msra.mxu1 %v4814_v21  ;;  %3225 = vmatprep.subr.bf16.mxu0 %v4808_v17 }
 0x6b1   :  { %3270 = vmatprep.subr.bf16.mxu1 %v4822_v24 }
 0x6b3   :  { %3226 = vmatpush1.bf16.msra.mxu0 %v4812_v20 }
 0x6b4   :  { %3271 = vmatpush1.bf16.msra.mxu1 %v4826_v26  ;;  %3227 = vmatprep.subr.bf16.mxu0 %v4820_v23 }
 0x6b5   :  { %3272 = vmatprep.subr.bf16.mxu1 %v4838_v30 }
 0x6b7   :  { %3228 = vmatpush1.bf16.msra.mxu0 %v4824_v25 }
 0x6b8   :  { %3273 = vmatpush1.bf16.msra.mxu1 %v4836_v29  ;;  %3229 = vmatprep.subr.bf16.mxu0 %v4834_v28 }
 0x6b9   :  { %3274 = vmatprep.subr.bf16.mxu1 %v4843_v33 }
 0x6bb   :  { %3230 = vmatpush1.bf16.msra.mxu0 %v4832_v27 }
 0x6bc   :  { %3275 = vmatpush1.bf16.msra.mxu1 %v4851_v35  ;;  %3231 = vmatprep.subr.bf16.mxu0 %v4840_v31 }
 0x6bd   :  { %3276 = vmatprep.subr.bf16.mxu1 %v4856_v37 }
 0x6bf   :  { %3232 = vmatpush1.bf16.msra.mxu0 %v4847_v34 }
 0x6c0   :  { %3277 = vmatpush1.bf16.msra.mxu1 %v4863_v39  ;;  %3233 = vmatprep.subr.bf16.mxu0 %v4853_v36 }
 0x6c1   :  { %3278 = vmatprep.subr.bf16.mxu1 %v4868_v42 }
 0x6c3   :  { %3234 = vmatpush1.bf16.msra.mxu0 %v4859_v38 }
 0x6c4   :  { %3279 = vmatpush1.bf16.msra.mxu1 %v4875_v43  ;;  %3235 = vmatprep.subr.bf16.mxu0 %v4865_v41 }
 0x6c7   :  { %3236 = vmatpush1.bf16.msra.mxu0 %v4871_v40 }
 0x77a   :  { %v2892_v17 = vpop.f32.mrb[24].mxu0  ;;  %v2935_v19 = vpop.f32.mrb[24].mxu1 }
 0x77b   :  { %v3833_v20 = vadd.f32 %v2892_v17, %v4662_v51  ;;  %v2894_v21 = vpop.f32.mrb[25].mxu0  ;;  %v2937_v23 = vpop.f32.mrb[25].mxu1  ;;  %v3865_v36 = vadd.f32 %v2935_v19, %v4669_v4 }
 0x77c   :  { %v3834_v24 = vadd.f32 %v2894_v21, %v4664_v52  ;;  %v2896_v25 = vpop.f32.mrb[26].mxu0  ;;  %v2939_v26 = vpop.f32.mrb[26].mxu1  ;;  %v3866_v38 = vadd.f32 %v2937_v23, %v4672_v32 }
 0x77d   :  { %v3705_v27 = vmul.f32 -1.442695, %v3833_v20  ;;  %v3835_v28 = vadd.f32 %v2896_v25, %v4662_v51  ;;  %v2898_v29 = vpop.f32.mrb[27].mxu0  ;;  %v2941_v30 = vpop.f32.mrb[27].mxu1  ;;  %v3867_v37 = vadd.f32 %v2939_v26, %v4669_v4  ;;  %v3707_v39 = vmul.f32 -1.442695, %v3865_v36 }
 0x77e   :  { %v3706_v31 = vmul.f32 -1.442695, %v3834_v24  ;;  %v3836_v33 = vadd.f32 %v2898_v29, %v4664_v52  ;;  %v3868_v40 = vadd.f32 %v2941_v30, %v4672_v32 }
 0x77f   :  { %4255 = vpow2.f32 %v3705_v27  ;;  %v3708_v34 = vmul.f32 -1.442695, %v3835_v28  ;;  %v3710_v41 = vmul.f32 -1.442695, %v3867_v37 }
 0x780   :  { %v3709_v35 = vmul.f32 -1.442695, %v3836_v33  ;;  %4257 = vpow2.f32 %v3706_v31 }
 0x781   :  { %4259 = vpow2.f32 %v3708_v34 }
 0x782   :  { %4261 = vpow2.f32 %v3709_v35 }
 0x783   :  { %4263 = vtanh.f32 %v3866_v38 }
 0x784   :  { %4265 = vpow2.f32 %v3707_v39 }
 0x785   :  { %4267 = vpow2.f32 %v3710_v41 }
 0x789   :  { %v4256_v42 = vpop.eup %4255 }
 0x78a   :  { %v2979_v43 = vadd.f32 1.0, %v4256_v42  ;;  %v4258_v5 = vpop.eup %4257 }
 0x78b   :  { %v4260_v2 = vpop.eup %4259  ;;  %v2980_v61 = vadd.f32 1.0, %v4258_v5 }
 0x78c   :  { %4269 = vrcp.f32 %v2979_v43  ;;  %v2982_v12 = vadd.f32 1.0, %v4260_v2  ;;  %v4262_v7 = vpop.eup %4261 }
 0x78d   :  { %4271 = vtanh.f32 %v3868_v40  ;;  %v2983_v59 = vadd.f32 1.0, %v4262_v7  ;;  %v4264_v62 = vpop.eup %4263 }
 0x78e   :  { %4273 = vrcp.f32 %v2980_v61  ;;  %v4266_v44 = vpop.eup %4265 }
 0x78f   :  { %4275 = vrcp.f32 %v2982_v12  ;;  %v4268_v46 = vpop.eup %4267  ;;  %v2981_v45 = vadd.f32 1.0, %v4266_v44 }
 0x790   :  { %4277 = vrcp.f32 %v2983_v59  ;;  %v2984_v8 = vadd.f32 1.0, %v4268_v46 }
 0x791   :  { %4279 = vrcp.f32 %v2981_v45 }
 0x796   :  { %v4270_v15 = vpop.eup %4269 }
 0x797   :  { %v4272_v16 = vpop.eup %4271  ;;  %v3001_v18 = vmul.f32 %v4270_v15, %v4264_v62 }
 0x798   :  { %v4274_v3 = vpop.eup %4273 }
 0x799   :  { %v4276_v11 = vpop.eup %4275  ;;  %v2999_v47 = vmul.f32 %v4274_v3, %v4990_v49 }
 0x79a   :  { %v3002_v50 = vmul.f32 %v4276_v11, %v4272_v16  ;;  %v4278_v48 = vpop.eup %4277 }
 0x79b   :  { %v5035_v6 = vadd.f32 %v3001_v18, %v2999_v47  ;;  %v3000_v9 = vmul.f32 %v4278_v48, %v4994_v54  ;;  %v4280_v63 = vpop.eup %4279 }
 0x79d   :  { %4281 = vtanh.f32 %v5035_v6  ;;  %v5039_v53 = vadd.f32 %v3002_v50, %v3000_v9 }
 0x79e   :  { %4283 = vrcp.f32 %v2984_v8 }
 0x79f   :  { %4285 = vtanh.f32 %v5039_v53 }
 0x7a7   :  { %v4282_v55 = vpop.eup %4281 }
 0x7a8   :  { %v4284_v56 = vpop.eup %4283  ;;  %v3007_v49 = vmul.f32 %v4282_v55, %v4280_v63 }
 0x7a9   :  { %v4286_v10 = vpop.eup %4285 }
 0x7aa   :  { %v3008_v57 = vmul.f32 %v4286_v10, %v4284_v56 }
 0x7ac   :  { %v3802_v60 = vpack.c.bf16 %v3008_v57, %v3007_v49 }
 0x7ae   :  { %3803 = vst [vmem:[#allocation11 + $0x30] sm:$0xff] %v3802_v60   ;;  %3254 = vmatmul.mubr.bf16.vlgmr.msra.gmra.mrb[28].mxu0 %v3802_v60  ;;  %3297 = vmatmul.mubr.bf16.vlgmr.msra.gmra.mrb[28].mxu1 %v3802_v60 }
 0x881   :  { %v3255_v58 = vpop.f32.mrb[28].mxu0  ;;  %v3298_v54 = vpop.f32.mrb[28].mxu1 }
 0x882   :  { %v3837_v1 = vadd.f32 %v3255_v58, %v4662_v51  ;;  %v3257_v0 = vpop.f32.mrb[29].mxu0  ;;  %v3300_v22 = vpop.f32.mrb[29].mxu1  ;;  %v3869_v28 = vadd.f32 %v3298_v54, %v4669_v4 }
 0x883   :  { %v3838_v13 = vadd.f32 %v3257_v0, %v4664_v52  ;;  %v3259_v14 = vpop.f32.mrb[30].mxu0  ;;  %v3302_v17 = vpop.f32.mrb[30].mxu1  ;;  %v3870_v30 = vadd.f32 %v3300_v22, %v4672_v32 }
 0x884   :  { %v3745_v19 = vmul.f32 -1.442695, %v3837_v1  ;;  %v3839_v20 = vadd.f32 %v3259_v14, %v4662_v51  ;;  %v3261_v21 = vpop.f32.mrb[31].mxu0  ;;  %v3304_v23 = vpop.f32.mrb[31].mxu1  ;;  %v3871_v29 = vadd.f32 %v3302_v17, %v4669_v4  ;;  %v3747_v31 = vmul.f32 -1.442695, %v3869_v28 }
 0x885   :  { %v3746_v24 = vmul.f32 -1.442695, %v3838_v13  ;;  %v3840_v25 = vadd.f32 %v3261_v21, %v4664_v52  ;;  %v3872_v34 = vadd.f32 %v3304_v23, %v4672_v32 }
 0x886   :  { %4287 = vpow2.f32 %v3745_v19  ;;  %v3748_v26 = vmul.f32 -1.442695, %v3839_v20  ;;  %v3750_v33 = vmul.f32 -1.442695, %v3871_v29 }
 0x887   :  { %v3749_v27 = vmul.f32 -1.442695, %v3840_v25  ;;  %4289 = vpow2.f32 %v3746_v24 }
 0x888   :  { %4291 = vpow2.f32 %v3748_v26 }
 0x889   :  { %4293 = vpow2.f32 %v3749_v27 }
 0x88a   :  { %4295 = vtanh.f32 %v3870_v30 }
 0x88b   :  { %4297 = vpow2.f32 %v3747_v31 }
 0x88c   :  { %4299 = vpow2.f32 %v3750_v33 }
 0x890   :  { %v4288_v51 = vpop.eup %4287 }
 0x891   :  { %v3342_v35 = vadd.f32 1.0, %v4288_v51  ;;  %v4290_v52 = vpop.eup %4289 }
 0x892   :  { %v4292_v36 = vpop.eup %4291  ;;  %v3343_v37 = vadd.f32 1.0, %v4290_v52 }
 0x893   :  { %4301 = vrcp.f32 %v3342_v35  ;;  %v3345_v38 = vadd.f32 1.0, %v4292_v36  ;;  %v4294_v39 = vpop.eup %4293 }
 0x894   :  { %4303 = vtanh.f32 %v3872_v34  ;;  %v3346_v4 = vadd.f32 1.0, %v4294_v39  ;;  %v4296_v41 = vpop.eup %4295 }
 0x895   :  { %4305 = vrcp.f32 %v3343_v37  ;;  %v4298_v42 = vpop.eup %4297 }
 0x896   :  { %4307 = vrcp.f32 %v3345_v38  ;;  %v4300_v40 = vpop.eup %4299  ;;  %v3344_v61 = vadd.f32 1.0, %v4298_v42 }
 0x897   :  { %4309 = vrcp.f32 %v3346_v4  ;;  %v3347_v46 = vadd.f32 1.0, %v4300_v40 }
 0x898   :  { %4311 = vrcp.f32 %v3344_v61 }
 0x89d   :  { %v4302_v43 = vpop.eup %4301 }
 0x89e   :  { %v4304_v5 = vpop.eup %4303  ;;  %v3364_v32 = vmul.f32 %v4302_v43, %v4296_v41 }
 0x89f   :  { %v4306_v2 = vpop.eup %4305 }
 0x8a0   :  { %v4308_v12 = vpop.eup %4307  ;;  %v3362_v7 = vmul.f32 %v4306_v2, %v5035_v6 }
 0x8a1   :  { %v3365_v59 = vmul.f32 %v4308_v12, %v4304_v5  ;;  %v4310_v62 = vpop.eup %4309 }
 0x8a2   :  { %v3366_v44 = vadd.f32 %v3364_v32, %v3362_v7  ;;  %v3363_v15 = vmul.f32 %v4310_v62, %v5039_v53  ;;  %v4312_v18 = vpop.eup %4311 }
 0x8a4   :  { %4313 = vtanh.f32 %v3366_v44  ;;  %v3367_v16 = vadd.f32 %v3365_v59, %v3363_v15 }
 0x8a5   :  { %4315 = vrcp.f32 %v3347_v46 }
 0x8a6   :  { %4317 = vtanh.f32 %v3367_v16 }
 0x8ae   :  { %v4314_v3 = vpop.eup %4313 }
 0x8af   :  { %v3370_v11 = vmul.f32 %v4314_v3, %v4312_v18  ;;  %v4316_v45 = vpop.eup %4315 }
 0x8b0   :  { %v4318_v47 = vpop.eup %4317 }
 0x8b1   :  { %v3371_v50 = vmul.f32 %v4318_v47, %v4316_v45 }
 0x8b3   :  { %v3807_v48 = vpack.c.bf16 %v3371_v50, %v3370_v11 }
 0x8b5   :  { %3808 = vst [vmem:[#allocation11 + $0x38] sm:$0xff] %v3807_v48  }
 0x8b6   :  { %4396 = shalt.err (!%p4393_p0)
}
 0x8b7   :  { %s4397_s6 = scalar_lea.hbm %s5071_s4, 1024 }
 0x8b8   :  { %p4398_p1 = scmp.ne.s32.totalorder %s5071_s4, %s4397_s6  ;;  %p4401_p2 = scmp.lt.u32.totalorder %s4397_s6, %s5071_s4 }
 0x8ba   :  { %p4403_p3 = pnand %p4401_p2, %p4398_p1 }
 0x8bc   :  { %4406 = shalt.err (!%p4403_p3)
}
 0x8bd   :  { %3398 = dma.vmem_to_hbm [thread:$0]  %s3393_s26, 1024, %s5071_s4, [#allocation7], %s4417_s1, %s4417_s1, %s4418_s13  }
 0x8be   :  { %4411 = dma.done.wait [#allocation7], 1024  }
 0x8bf   :  { %4412 = vsyncadd [#allocation7], 4294966272 }
 0x8c0   :  { %3402 = vsyncpa [#allocation6], 1 }
 0x8c1   :  { %3403 = vsyncpa [#allocation9], 1 }
 0x8c2   :  { %3404 = vsyncpa [#allocation7], 1 }

</bundles_post_ra>
